<compile_context>
chip_gen: v7x
topology: tpu7x:2x2x1
jax: 0.10.0
libtpu: 0.0.40
codegen_flags: <defaults>
</compile_context>

<pallas_src>
import numpy as np

import jax
import jax.numpy as jnp
from jax import lax
from jax.experimental import pallas as pl
from jax.experimental.pallas import tpu as pltpu

# ---- synthetic "opt" hyper-parameters (small, deterministic) ----
FM_CHAN = 32      # opt.fm_chan
IM_CHAN = 3       # opt.im_chan
LATENT = 32       # opt.latent_size
STAGE = 1         # Generator(stage=1): 4x4 -> 8x8
ALPHA = 0.0       # module sets self.alpha = 0
LRELU = 0.2
PN_EPS = 1e-8     # pixel-norm eps (mapping net)
IN_EPS = 1e-5     # instance-norm eps (AdaIN), nn.InstanceNorm2d default

_TB_MAX = 256     # max batch rows per grid step


# --------------------------------------------------------------------------
# Constant structure matrices (trace-time constants / tiny wrapper-side XLA)
# --------------------------------------------------------------------------
def _conv3x3_dense(w, r):
    """3x3 'same' conv on an r x r grid as one dense (r*r*Cin, r*r*Cout) matmul."""
    cin, cout = w.shape[2], w.shape[3]
    t = np.zeros((r, r, r, r, 3, 3), np.float32)       # (qy,qx,py,px,ky,kx)
    for ky in range(3):
        for kx in range(3):
            for py in range(r):
                qy = py + ky - 1
                if not 0 <= qy < r:
                    continue
                for px in range(r):
                    qx = px + kx - 1
                    if 0 <= qx < r:
                        t[qy, qx, py, px, ky, kx] = 1.0
    m = jnp.einsum('abpqyx,yxio->abipqo', jnp.asarray(t), w)
    return m.reshape(r * r * cin, r * r * cout)


def _up2_dense(r, c):
    """Nearest-neighbour 2x upsample (flat r*r*c -> flat 2r*2r*c) as a 0/1 matrix."""
    u = np.zeros((r, r, c, 2 * r, 2 * r, c), np.float32)
    ar = np.arange(c)
    for qy in range(r):
        for qx in range(r):
            for dy in range(2):
                for dx in range(2):
                    u[qy, qx, ar, 2 * qy + dy, 2 * qx + dx, ar] = 1.0
    return u.reshape(r * r * c, 4 * r * r * c)


def _conv1x1_dense(w, r):
    """1x1 conv as a block-diagonal (r*r*Cin, r*r*Cout) matrix."""
    eye = jnp.asarray(np.eye(r * r, dtype=np.float32))
    m = jnp.einsum('pq,io->piqo', eye, w)
    return m.reshape(r * r * w.shape[0], r * r * w.shape[1])


def _avg_dense(r, c):
    """Spatial-mean matrix (r*r*c, c): per-channel mean over r*r positions."""
    a = np.zeros((r * r, c, c), np.float32)
    a[:, np.arange(c), np.arange(c)] = 1.0 / (r * r)
    return a.reshape(r * r * c, c)


def _bcast_dense(r, c):
    """Per-channel -> flat broadcast matrix (c, r*r*c)."""
    b = np.zeros((c, r * r, c), np.float32)
    b[np.arange(c), :, np.arange(c)] = 1.0
    return b.reshape(c, r * r * c)


def _choose_batch_tile(n):
    # Multiple-of-8 batch tiles (sublane aligned), capped at _TB_MAX; aim for
    # >= 2 grid steps (v7x megacore) once the batch is big enough.
    if n >= 2 * _TB_MAX:
        return _TB_MAX
    half = -(-n // 2)
    return max(8, -(-half // 8) * 8)


# --------------------------------------------------------------------------
# Fused generator kernel (one pallas_call; one batch tile per grid step)
# --------------------------------------------------------------------------
def _make_fused_kernel(n_blocks, stage, alpha, C):
    skip_last = (alpha == 0.0)
    need_fade_up = (not skip_last) and (stage >= 1)
    bf16 = jnp.bfloat16

    def leaky(x):
        return jnp.where(x >= 0, x, LRELU * x)

    def mm(a, b):       # bf16 MXU matmul, f32 accumulate (big GEMMs)
        return jnp.dot(a.astype(bf16), b, preferred_element_type=jnp.float32)

    def mm32(a, b):     # f32 matmul (IN stats / AdaIN broadcast: kept f32 so
        return jnp.dot(a, b, preferred_element_type=jnp.float32)  # var->0 is safe

    def kernel(*refs):
        z_ref, mw1, mb1, mw2, mb2, start_ref = refs[:6]
        pos = 6
        blk = [refs[pos + 6 * j: pos + 6 * (j + 1)] for j in range(n_blocks)]
        pos += 6 * n_blocks
        u_fade = None
        if need_fade_up:
            u_fade = refs[pos]
            pos += 1
        fw_ref, fb_ref, out_ref = refs[pos], refs[pos + 1], refs[pos + 2]

        # ---- mapping net, once per batch tile: pixel-norm -> 2x dense+lrelu
        zv = z_ref[...].astype(jnp.float32)                     # (TB, L)
        zv = zv * lax.rsqrt(jnp.mean(zv * zv, axis=-1, keepdims=True) + PN_EPS)
        h = leaky(mm(zv, mw1[...]) + mb1[...])
        w_lat = leaky(mm(h, mw2[...]) + mb2[...])               # (TB, L)

        # ---- synthesis block: everything is a flat (rows, r*r*C) matmul ----
        def run_block(x, wc, bconv, sw, sb, aavg, bc):
            a = leaky(mm(x, wc[...]) + bconv[...])              # [up+]conv+bias
            mean = mm32(a, aavg[...])                           # (rows, C)
            var = jnp.maximum(mm32(a * a, aavg[...]) - mean * mean, 0.0)
            inv = lax.rsqrt(var + IN_EPS)                       # EUP
            style = mm(w_lat, sw[...]) + sb[...]                # (TB, 2C)
            ys, yb = style[:, :C], style[:, C:]
            g = inv * (1.0 + ys)                                # AdaIN gain
            b = yb - mean * g                                   # AdaIN bias
            return a * mm32(g, bc[...]) + mm32(b, bc[...])      # (TB, Kout)

        feats = [start_ref[...]]                                # (1, 16*C) f32
        for j in range(n_blocks):
            feats.append(run_block(feats[-1], *blk[j]))

        # ---- fade blend (alpha is a trace-time constant; alpha == 0 makes
        #      the last GBlock dead code -> it was never built) ----
        if skip_last:
            pre = feats[-1]
        elif stage >= 1:
            pre = (mm(feats[stage], u_fade[...]) * (1.0 - alpha)
                   + feats[stage + 1] * alpha)
        else:
            pre = feats[0] * (1.0 - alpha) + feats[1] * alpha

        # ---- final 1x1 conv + tanh (output padded to a 128-lane slab) ----
        y = jnp.tanh(mm(pre, fw_ref[...]) + fb_ref[...])
        out_ref[...] = jnp.broadcast_to(y, out_ref.shape).astype(out_ref.dtype)

    return kernel


# --------------------------------------------------------------------------
# Wrapper: builds the dense structure matrices + specs, runs the fused kernel
# --------------------------------------------------------------------------
def generator_forward(z, params, stage=STAGE, alpha=ALPHA):
    n, L = z.shape
    C = FM_CHAN
    alpha = float(alpha)
    skip_last = (alpha == 0.0)
    n_blocks = stage if skip_last else stage + 1
    bf16 = jnp.bfloat16

    def r_feat(k):                     # resolution of feats[k]
        return 4 * (2 ** max(k - 1, 0))

    kern_res = r_feat(n_blocks)        # resolution the final conv runs at
    out_dim = kern_res * kern_res * IM_CHAN
    out_dim_p = -(-out_dim // 128) * 128          # lane-dense (unmasked) store

    # ---- batch tiling ----
    tb = _choose_batch_tile(n)
    n_pad = -(-n // tb) * tb
    if n_pad != n:
        z = jnp.concatenate([z, jnp.zeros((n_pad - n, L), z.dtype)], axis=0)
    num_tiles = n_pad // tb

    # ---- inputs & specs ----
    inputs = [z]
    in_specs = [pl.BlockSpec((tb, L), lambda i: (i, 0))]

    def add(arr):
        inputs.append(arr)
        in_specs.append(pl.BlockSpec(arr.shape, lambda i: (0, 0)))

    add(params['map_w1'].astype(bf16))
    add(params['map_b1'].astype(jnp.float32))
    add(params['map_w2'].astype(bf16))
    add(params['map_b2'].astype(jnp.float32))
    add(params['start'].reshape(1, 16 * C).astype(jnp.float32))

    for j in range(n_blocks):
        r_in, r_out = r_feat(j), r_feat(j + 1)
        wc = _conv3x3_dense(params[f'conv_w_{j}'], r_out)       # (ro^2*C, ro^2*C)
        if r_out != r_in:                                       # fold 2x upsample
            wc = jnp.asarray(_up2_dense(r_in, C)) @ wc          # (ri^2*C, ro^2*C)
        add(wc.astype(bf16))
        add(jnp.tile(params[f'conv_b_{j}'], r_out * r_out)
            .reshape(1, -1).astype(jnp.float32))
        add(params[f'style_w_{j}'].astype(bf16))
        add(params[f'style_b_{j}'].astype(jnp.float32))
        add(jnp.asarray(_avg_dense(r_out, C)))                  # f32 (stats)
        add(jnp.asarray(_bcast_dense(r_out, C)))                # f32 (broadcast)

    if (not skip_last) and stage >= 1:
        add(jnp.asarray(_up2_dense(r_feat(stage), C), bf16))    # fade upsample

    fw = _conv1x1_dense(params['final_w'], kern_res)            # (K, out_dim)
    fw = jnp.concatenate(
        [fw, jnp.zeros((fw.shape[0], out_dim_p - out_dim), fw.dtype)], axis=1)
    fb = jnp.concatenate(
        [jnp.tile(params['final_b'], kern_res * kern_res),
         jnp.zeros((out_dim_p - out_dim,), jnp.float32)]).reshape(1, -1)
    add(fw.astype(bf16))
    add(fb.astype(jnp.float32))

    out_flat = pl.pallas_call(
        _make_fused_kernel(n_blocks, stage, alpha, C),
        out_shape=jax.ShapeDtypeStruct((n_pad, out_dim_p), jnp.float32),
        grid=(num_tiles,),
        in_specs=in_specs,
        out_specs=pl.BlockSpec((tb, out_dim_p), lambda i: (i, 0)),
        compiler_params=pltpu.CompilerParams(
            dimension_semantics=("parallel",),       # shard tiles across TCs
            vmem_limit_bytes=32 * 1024 * 1024),
    )(*inputs)

    # ---- wrapper epilogue: drop padding, deferred 2x upsample, NCHW ----
    img = out_flat[:n, :out_dim].reshape(n, kern_res, kern_res, IM_CHAN)
    if skip_last and stage >= 1:
        # deferred nearest 2x upsample == nnf.interpolate(lst, 2) exactly,
        # since the 1x1 conv and tanh are pointwise (broadcast + reshape,
        # no jnp.repeat).
        img = jnp.broadcast_to(img[:, :, None, :, None, :],
                               (n, kern_res, 2, kern_res, 2, IM_CHAN))
        img = img.reshape(n, 2 * kern_res, 2 * kern_res, IM_CHAN)
    return jnp.transpose(img, (0, 3, 1, 2))


# --------------------------------------------------------------------------
# Deterministic parameter init
# --------------------------------------------------------------------------
def init_params(key):
    ks = iter(jax.random.split(key, 64))

    def nrm(shape, fan_in):
        return (jax.random.normal(next(ks), shape, jnp.float32)
                / jnp.sqrt(float(fan_in)))

    p = {
        'map_w1': nrm((LATENT, LATENT), LATENT),
        'map_b1': 0.1 * jax.random.normal(next(ks), (1, LATENT), jnp.float32),
        'map_w2': nrm((LATENT, LATENT), LATENT),
        'map_b2': 0.1 * jax.random.normal(next(ks), (1, LATENT), jnp.float32),
        'final_w': nrm((FM_CHAN, IM_CHAN), FM_CHAN),
        'final_b': 0.1 * jax.random.normal(next(ks), (IM_CHAN,), jnp.float32),
        # nn.Parameter(torch.zeros(1, fm_chan, 4, 4)), stored here as NHWC
        'start': jnp.zeros((1, 4, 4, FM_CHAN), jnp.float32),
    }
    for i in range(STAGE + 1):   # only the blocks this stage can touch
        p[f'conv_w_{i}'] = nrm((3, 3, FM_CHAN, FM_CHAN), 9 * FM_CHAN)
        p[f'conv_b_{i}'] = 0.1 * jax.random.normal(
            next(ks), (FM_CHAN,), jnp.float32)
        p[f'style_w_{i}'] = nrm((LATENT, 2 * FM_CHAN), LATENT)
        p[f'style_b_{i}'] = 0.1 * jax.random.normal(
            next(ks), (1, 2 * FM_CHAN), jnp.float32)
    return p


if __name__ == "__main__":
    key = jax.random.PRNGKey(0)
    zkey, pkey = jax.random.split(key)

    batch = 16                   # small, but enough for a 2-step batch-tiled grid
    z = jax.random.normal(zkey, (batch, LATENT), jnp.float32)
    params = init_params(pkey)

    out = jax.jit(generator_forward)(z, params)
    out = jax.block_until_ready(out)

    res = 4 * (2 ** STAGE)       # stage=1 -> 8x8 image
    assert out.shape == (batch, IM_CHAN, res, res), out.shape
    assert out.dtype == jnp.float32
    assert bool(jnp.all(jnp.isfinite(out)))
    print("KERNEL_OK")
</pallas_src>

<mosaic_0001>
module attributes {stable_mosaic.version = 11 : i64} {
  func.func @kernel(%arg0: i32, %arg1: memref<8x32xf32, #tpu.memory_space<vmem>>, %arg2: memref<32x32xbf16, #tpu.memory_space<vmem>>, %arg3: memref<1x32xf32, #tpu.memory_space<vmem>>, %arg4: memref<32x32xbf16, #tpu.memory_space<vmem>>, %arg5: memref<1x32xf32, #tpu.memory_space<vmem>>, %arg6: memref<1x512xf32, #tpu.memory_space<vmem>>, %arg7: memref<512x512xbf16, #tpu.memory_space<vmem>>, %arg8: memref<1x512xf32, #tpu.memory_space<vmem>>, %arg9: memref<32x64xbf16, #tpu.memory_space<vmem>>, %arg10: memref<1x64xf32, #tpu.memory_space<vmem>>, %arg11: memref<512x32xf32, #tpu.memory_space<vmem>>, %arg12: memref<32x512xf32, #tpu.memory_space<vmem>>, %arg13: memref<512x128xbf16, #tpu.memory_space<vmem>>, %arg14: memref<1x128xf32, #tpu.memory_space<vmem>>, %arg15: memref<8x128xf32, #tpu.memory_space<vmem>>) attributes {dimension_semantics = [#tpu.dimension_semantics<parallel>], iteration_bounds = array<i64: 2>, scalar_prefetch = 0 : i64, scratch_operands = 0 : i64, tpu.core_type = #tpu.core_type<tc>, window_params = [{transform_indices = @transform_0, window_bounds = array<i64: 8, 32>}, {pipeline_mode = #tpu.pipeline_mode<synchronous>, transform_indices = @transform_1, window_bounds = array<i64: 32, 32>}, {pipeline_mode = #tpu.pipeline_mode<synchronous>, transform_indices = @transform_2, window_bounds = array<i64: 1, 32>}, {pipeline_mode = #tpu.pipeline_mode<synchronous>, transform_indices = @transform_3, window_bounds = array<i64: 32, 32>}, {pipeline_mode = #tpu.pipeline_mode<synchronous>, transform_indices = @transform_4, window_bounds = array<i64: 1, 32>}, {pipeline_mode = #tpu.pipeline_mode<synchronous>, transform_indices = @transform_5, window_bounds = array<i64: 1, 512>}, {pipeline_mode = #tpu.pipeline_mode<synchronous>, transform_indices = @transform_6, window_bounds = array<i64: 512, 512>}, {pipeline_mode = #tpu.pipeline_mode<synchronous>, transform_indices = @transform_7, window_bounds = array<i64: 1, 512>}, {pipeline_mode = #tpu.pipeline_mode<synchronous>, transform_indices = @transform_8, window_bounds = array<i64: 32, 64>}, {pipeline_mode = #tpu.pipeline_mode<synchronous>, transform_indices = @transform_9, window_bounds = array<i64: 1, 64>}, {pipeline_mode = #tpu.pipeline_mode<synchronous>, transform_indices = @transform_10, window_bounds = array<i64: 512, 32>}, {pipeline_mode = #tpu.pipeline_mode<synchronous>, transform_indices = @transform_11, window_bounds = array<i64: 32, 512>}, {pipeline_mode = #tpu.pipeline_mode<synchronous>, transform_indices = @transform_12, window_bounds = array<i64: 512, 128>}, {pipeline_mode = #tpu.pipeline_mode<synchronous>, transform_indices = @transform_13, window_bounds = array<i64: 1, 128>}, {transform_indices = @transform_14, window_bounds = array<i64: 8, 128>}]} {
    %c0 = arith.constant 0 : index
    %c0_0 = arith.constant 0 : index
    %0 = vector.load %arg1[%c0, %c0_0] : memref<8x32xf32, #tpu.memory_space<vmem>>, vector<8x32xf32>
    %1 = arith.mulf %0, %0 : vector<8x32xf32>
    %cst = arith.constant dense<0.000000e+00> : vector<8xf32>
    %2 = vector.multi_reduction <add>, %1, %cst [1] : vector<8x32xf32> to vector<8xf32>
    %3 = vector.shape_cast %2 : vector<8xf32> to vector<8x1xf32>
    %cst_1 = arith.constant 3.200000e+01 : f32
    %4 = vector.broadcast %cst_1 : f32 to vector<8x1xf32>
    %5 = arith.divf %3, %4 : vector<8x1xf32>
    %cst_2 = arith.constant 9.99999993E-9 : f32
    %6 = vector.broadcast %cst_2 : f32 to vector<8x1xf32>
    %7 = arith.addf %5, %6 : vector<8x1xf32>
    %8 = math.rsqrt %7 : vector<8x1xf32>
    %9 = vector.broadcast %8 : vector<8x1xf32> to vector<8x32xf32>
    %10 = arith.mulf %0, %9 : vector<8x32xf32>
    %c0_3 = arith.constant 0 : index
    %c0_4 = arith.constant 0 : index
    %11 = vector.load %arg2[%c0_3, %c0_4] : memref<32x32xbf16, #tpu.memory_space<vmem>>, vector<32x32xbf16>
    %12 = arith.truncf %10 : vector<8x32xf32> to vector<8x32xbf16>
    %cst_5 = arith.constant dense<0.000000e+00> : vector<8x32xf32>
    %13 = tpu.matmul %12, %11, %cst_5 {dimension_numbers = #tpu.dot_dimension_numbers<[1], [0], [0], [1], [0, 0, 1, 1], [], []>} : vector<8x32xbf16>, vector<32x32xbf16>, vector<8x32xf32> -> vector<8x32xf32>
    %c0_6 = arith.constant 0 : index
    %c0_7 = arith.constant 0 : index
    %14 = vector.load %arg3[%c0_6, %c0_7] : memref<1x32xf32, #tpu.memory_space<vmem>>, vector<1x32xf32>
    %15 = vector.broadcast %14 : vector<1x32xf32> to vector<8x32xf32>
    %16 = arith.addf %13, %15 : vector<8x32xf32>
    %cst_8 = arith.constant 0.000000e+00 : f32
    %17 = vector.broadcast %cst_8 : f32 to vector<8x32xf32>
    %18 = arith.cmpf oge, %16, %17 : vector<8x32xf32>
    %cst_9 = arith.constant 2.000000e-01 : f32
    %19 = vector.broadcast %cst_9 : f32 to vector<8x32xf32>
    %20 = arith.mulf %19, %16 : vector<8x32xf32>
    %21 = arith.select %18, %16, %20 : vector<8x32xi1>, vector<8x32xf32>
    %c0_10 = arith.constant 0 : index
    %c0_11 = arith.constant 0 : index
    %22 = vector.load %arg4[%c0_10, %c0_11] : memref<32x32xbf16, #tpu.memory_space<vmem>>, vector<32x32xbf16>
    %23 = arith.truncf %21 : vector<8x32xf32> to vector<8x32xbf16>
    %cst_12 = arith.constant dense<0.000000e+00> : vector<8x32xf32>
    %24 = tpu.matmul %23, %22, %cst_12 {dimension_numbers = #tpu.dot_dimension_numbers<[1], [0], [0], [1], [0, 0, 1, 1], [], []>} : vector<8x32xbf16>, vector<32x32xbf16>, vector<8x32xf32> -> vector<8x32xf32>
    %c0_13 = arith.constant 0 : index
    %c0_14 = arith.constant 0 : index
    %25 = vector.load %arg5[%c0_13, %c0_14] : memref<1x32xf32, #tpu.memory_space<vmem>>, vector<1x32xf32>
    %26 = vector.broadcast %25 : vector<1x32xf32> to vector<8x32xf32>
    %27 = arith.addf %24, %26 : vector<8x32xf32>
    %cst_15 = arith.constant 0.000000e+00 : f32
    %28 = vector.broadcast %cst_15 : f32 to vector<8x32xf32>
    %29 = arith.cmpf oge, %27, %28 : vector<8x32xf32>
    %cst_16 = arith.constant 2.000000e-01 : f32
    %30 = vector.broadcast %cst_16 : f32 to vector<8x32xf32>
    %31 = arith.mulf %30, %27 : vector<8x32xf32>
    %32 = arith.select %29, %27, %31 : vector<8x32xi1>, vector<8x32xf32>
    %c0_17 = arith.constant 0 : index
    %c0_18 = arith.constant 0 : index
    %33 = vector.load %arg6[%c0_17, %c0_18] : memref<1x512xf32, #tpu.memory_space<vmem>>, vector<1x512xf32>
    %c0_19 = arith.constant 0 : index
    %c0_20 = arith.constant 0 : index
    %34 = vector.load %arg7[%c0_19, %c0_20] : memref<512x512xbf16, #tpu.memory_space<vmem>>, vector<512x512xbf16>
    %35 = arith.truncf %33 : vector<1x512xf32> to vector<1x512xbf16>
    %cst_21 = arith.constant dense<0.000000e+00> : vector<1x512xf32>
    %36 = tpu.matmul %35, %34, %cst_21 {dimension_numbers = #tpu.dot_dimension_numbers<[1], [0], [0], [1], [0, 0, 1, 1], [], []>} : vector<1x512xbf16>, vector<512x512xbf16>, vector<1x512xf32> -> vector<1x512xf32>
    %c0_22 = arith.constant 0 : index
    %c0_23 = arith.constant 0 : index
    %37 = vector.load %arg8[%c0_22, %c0_23] : memref<1x512xf32, #tpu.memory_space<vmem>>, vector<1x512xf32>
    %38 = arith.addf %36, %37 : vector<1x512xf32>
    %cst_24 = arith.constant 0.000000e+00 : f32
    %39 = vector.broadcast %cst_24 : f32 to vector<1x512xf32>
    %40 = arith.cmpf oge, %38, %39 : vector<1x512xf32>
    %cst_25 = arith.constant 2.000000e-01 : f32
    %41 = vector.broadcast %cst_25 : f32 to vector<1x512xf32>
    %42 = arith.mulf %41, %38 : vector<1x512xf32>
    %43 = arith.select %40, %38, %42 : vector<1x512xi1>, vector<1x512xf32>
    %c0_26 = arith.constant 0 : index
    %c0_27 = arith.constant 0 : index
    %44 = vector.load %arg11[%c0_26, %c0_27] : memref<512x32xf32, #tpu.memory_space<vmem>>, vector<512x32xf32>
    %cst_28 = arith.constant dense<0.000000e+00> : vector<1x32xf32>
    %45 = tpu.matmul %43, %44, %cst_28 {dimension_numbers = #tpu.dot_dimension_numbers<[1], [0], [0], [1], [0, 0, 1, 1], [], []>} : vector<1x512xf32>, vector<512x32xf32>, vector<1x32xf32> -> vector<1x32xf32>
    %46 = arith.mulf %43, %43 : vector<1x512xf32>
    %c0_29 = arith.constant 0 : index
    %c0_30 = arith.constant 0 : index
    %47 = vector.load %arg11[%c0_29, %c0_30] : memref<512x32xf32, #tpu.memory_space<vmem>>, vector<512x32xf32>
    %cst_31 = arith.constant dense<0.000000e+00> : vector<1x32xf32>
    %48 = tpu.matmul %46, %47, %cst_31 {dimension_numbers = #tpu.dot_dimension_numbers<[1], [0], [0], [1], [0, 0, 1, 1], [], []>} : vector<1x512xf32>, vector<512x32xf32>, vector<1x32xf32> -> vector<1x32xf32>
    %49 = arith.mulf %45, %45 : vector<1x32xf32>
    %50 = arith.subf %48, %49 : vector<1x32xf32>
    %cst_32 = arith.constant 0.000000e+00 : f32
    %51 = vector.broadcast %cst_32 : f32 to vector<1x32xf32>
    %52 = arith.maximumf %50, %51 : vector<1x32xf32>
    %cst_33 = arith.constant 9.99999974E-6 : f32
    %53 = vector.broadcast %cst_33 : f32 to vector<1x32xf32>
    %54 = arith.addf %52, %53 : vector<1x32xf32>
    %55 = math.rsqrt %54 : vector<1x32xf32>
    %c0_34 = arith.constant 0 : index
    %c0_35 = arith.constant 0 : index
    %56 = vector.load %arg9[%c0_34, %c0_35] : memref<32x64xbf16, #tpu.memory_space<vmem>>, vector<32x64xbf16>
    %57 = arith.truncf %32 : vector<8x32xf32> to vector<8x32xbf16>
    %cst_36 = arith.constant dense<0.000000e+00> : vector<8x64xf32>
    %58 = tpu.matmul %57, %56, %cst_36 {dimension_numbers = #tpu.dot_dimension_numbers<[1], [0], [0], [1], [0, 0, 1, 1], [], []>} : vector<8x32xbf16>, vector<32x64xbf16>, vector<8x64xf32> -> vector<8x64xf32>
    %c0_37 = arith.constant 0 : index
    %c0_38 = arith.constant 0 : index
    %59 = vector.load %arg10[%c0_37, %c0_38] : memref<1x64xf32, #tpu.memory_space<vmem>>, vector<1x64xf32>
    %60 = vector.broadcast %59 : vector<1x64xf32> to vector<8x64xf32>
    %61 = arith.addf %58, %60 : vector<8x64xf32>
    %62 = vector.extract_strided_slice %61 {offsets = [0, 0], sizes = [8, 32], strides = [1, 1]} : vector<8x64xf32> to vector<8x32xf32>
    %63 = vector.extract_strided_slice %61 {offsets = [0, 32], sizes = [8, 32], strides = [1, 1]} : vector<8x64xf32> to vector<8x32xf32>
    %cst_39 = arith.constant 1.000000e+00 : f32
    %64 = vector.broadcast %cst_39 : f32 to vector<8x32xf32>
    %65 = arith.addf %64, %62 : vector<8x32xf32>
    %66 = vector.broadcast %55 : vector<1x32xf32> to vector<8x32xf32>
    %67 = arith.mulf %66, %65 : vector<8x32xf32>
    %68 = vector.broadcast %45 : vector<1x32xf32> to vector<8x32xf32>
    %69 = arith.mulf %68, %67 : vector<8x32xf32>
    %70 = arith.subf %63, %69 : vector<8x32xf32>
    %c0_40 = arith.constant 0 : index
    %c0_41 = arith.constant 0 : index
    %71 = vector.load %arg12[%c0_40, %c0_41] : memref<32x512xf32, #tpu.memory_space<vmem>>, vector<32x512xf32>
    %cst_42 = arith.constant dense<0.000000e+00> : vector<8x512xf32>
    %72 = tpu.matmul %67, %71, %cst_42 {dimension_numbers = #tpu.dot_dimension_numbers<[1], [0], [0], [1], [0, 0, 1, 1], [], []>} : vector<8x32xf32>, vector<32x512xf32>, vector<8x512xf32> -> vector<8x512xf32>
    %73 = vector.broadcast %43 : vector<1x512xf32> to vector<8x512xf32>
    %74 = arith.mulf %73, %72 : vector<8x512xf32>
    %c0_43 = arith.constant 0 : index
    %c0_44 = arith.constant 0 : index
    %75 = vector.load %arg12[%c0_43, %c0_44] : memref<32x512xf32, #tpu.memory_space<vmem>>, vector<32x512xf32>
    %cst_45 = arith.constant dense<0.000000e+00> : vector<8x512xf32>
    %76 = tpu.matmul %70, %75, %cst_45 {dimension_numbers = #tpu.dot_dimension_numbers<[1], [0], [0], [1], [0, 0, 1, 1], [], []>} : vector<8x32xf32>, vector<32x512xf32>, vector<8x512xf32> -> vector<8x512xf32>
    %77 = arith.addf %74, %76 : vector<8x512xf32>
    %c0_46 = arith.constant 0 : index
    %c0_47 = arith.constant 0 : index
    %78 = vector.load %arg13[%c0_46, %c0_47] : memref<512x128xbf16, #tpu.memory_space<vmem>>, vector<512x128xbf16>
    %79 = arith.truncf %77 : vector<8x512xf32> to vector<8x512xbf16>
    %cst_48 = arith.constant dense<0.000000e+00> : vector<8x128xf32>
    %80 = tpu.matmul %79, %78, %cst_48 {dimension_numbers = #tpu.dot_dimension_numbers<[1], [0], [0], [1], [0, 0, 1, 1], [], []>} : vector<8x512xbf16>, vector<512x128xbf16>, vector<8x128xf32> -> vector<8x128xf32>
    %c0_49 = arith.constant 0 : index
    %c0_50 = arith.constant 0 : index
    %81 = vector.load %arg14[%c0_49, %c0_50] : memref<1x128xf32, #tpu.memory_space<vmem>>, vector<1x128xf32>
    %82 = vector.broadcast %81 : vector<1x128xf32> to vector<8x128xf32>
    %83 = arith.addf %80, %82 : vector<8x128xf32>
    %84 = math.tanh %83 : vector<8x128xf32>
    %c0_51 = arith.constant 0 : index
    %c0_52 = arith.constant 0 : index
    %85 = vector.load %arg15[%c0_51, %c0_52] : memref<8x128xf32, #tpu.memory_space<vmem>>, vector<8x128xf32>
    tpu.vector_store %arg15[%c0_51, %c0_52], %84 {strides = array<i32>} : memref<8x128xf32, #tpu.memory_space<vmem>>, vector<8x128xf32>,
    return
  }
  func.func @transform_0(%arg0: i32) -> (i32, i32) {
    %c0_i32 = arith.constant 0 : i32
    %c0_i32_0 = arith.constant 0 : i32
    return %arg0, %c0_i32 : i32, i32
  }
  func.func @transform_1(%arg0: i32) -> (i32, i32) {
    %c0_i32 = arith.constant 0 : i32
    %c0_i32_0 = arith.constant 0 : i32
    %c0_i32_1 = arith.constant 0 : i32
    return %c0_i32, %c0_i32_0 : i32, i32
  }
  func.func @transform_2(%arg0: i32) -> (i32, i32) {
    %c0_i32 = arith.constant 0 : i32
    %c0_i32_0 = arith.constant 0 : i32
    %c0_i32_1 = arith.constant 0 : i32
    return %c0_i32, %c0_i32_0 : i32, i32
  }
  func.func @transform_3(%arg0: i32) -> (i32, i32) {
    %c0_i32 = arith.constant 0 : i32
    %c0_i32_0 = arith.constant 0 : i32
    %c0_i32_1 = arith.constant 0 : i32
    return %c0_i32, %c0_i32_0 : i32, i32
  }
  func.func @transform_4(%arg0: i32) -> (i32, i32) {
    %c0_i32 = arith.constant 0 : i32
    %c0_i32_0 = arith.constant 0 : i32
    %c0_i32_1 = arith.constant 0 : i32
    return %c0_i32, %c0_i32_0 : i32, i32
  }
  func.func @transform_5(%arg0: i32) -> (i32, i32) {
    %c0_i32 = arith.constant 0 : i32
    %c0_i32_0 = arith.constant 0 : i32
    %c0_i32_1 = arith.constant 0 : i32
    return %c0_i32, %c0_i32_0 : i32, i32
  }
  func.func @transform_6(%arg0: i32) -> (i32, i32) {
    %c0_i32 = arith.constant 0 : i32
    %c0_i32_0 = arith.constant 0 : i32
    %c0_i32_1 = arith.constant 0 : i32
    return %c0_i32, %c0_i32_0 : i32, i32
  }
  func.func @transform_7(%arg0: i32) -> (i32, i32) {
    %c0_i32 = arith.constant 0 : i32
    %c0_i32_0 = arith.constant 0 : i32
    %c0_i32_1 = arith.constant 0 : i32
    return %c0_i32, %c0_i32_0 : i32, i32
  }
  func.func @transform_8(%arg0: i32) -> (i32, i32) {
    %c0_i32 = arith.constant 0 : i32
    %c0_i32_0 = arith.constant 0 : i32
    %c0_i32_1 = arith.constant 0 : i32
    return %c0_i32, %c0_i32_0 : i32, i32
  }
  func.func @transform_9(%arg0: i32) -> (i32, i32) {
    %c0_i32 = arith.constant 0 : i32
    %c0_i32_0 = arith.constant 0 : i32
    %c0_i32_1 = arith.constant 0 : i32
    return %c0_i32, %c0_i32_0 : i32, i32
  }
  func.func @transform_10(%arg0: i32) -> (i32, i32) {
    %c0_i32 = arith.constant 0 : i32
    %c0_i32_0 = arith.constant 0 : i32
    %c0_i32_1 = arith.constant 0 : i32
    return %c0_i32, %c0_i32_0 : i32, i32
  }
  func.func @transform_11(%arg0: i32) -> (i32, i32) {
    %c0_i32 = arith.constant 0 : i32
    %c0_i32_0 = arith.constant 0 : i32
    %c0_i32_1 = arith.constant 0 : i32
    return %c0_i32, %c0_i32_0 : i32, i32
  }
  func.func @transform_12(%arg0: i32) -> (i32, i32) {
    %c0_i32 = arith.constant 0 : i32
    %c0_i32_0 = arith.constant 0 : i32
    %c0_i32_1 = arith.constant 0 : i32
    return %c0_i32, %c0_i32_0 : i32, i32
  }
  func.func @transform_13(%arg0: i32) -> (i32, i32) {
    %c0_i32 = arith.constant 0 : i32
    %c0_i32_0 = arith.constant 0 : i32
    %c0_i32_1 = arith.constant 0 : i32
    return %c0_i32, %c0_i32_0 : i32, i32
  }
  func.func @transform_14(%arg0: i32) -> (i32, i32) {
    %c0_i32 = arith.constant 0 : i32
    %c0_i32_0 = arith.constant 0 : i32
    return %arg0, %c0_i32 : i32, i32
  }
}

</mosaic_0001>

<bundles_post_ra>
// kernel: tile.13
= control target key start
LH: loop header
LB: loop body
LE: loop exit
PB: predicated region body
PF: predicated region fallthrough
CT: control target
= control target key end

     0   :  { %s28_s0 = inlined_call_operand.vmem [shape: f32[32], index: 0, kind: input, shape index: {}]   ;;  %s29_s1 = inlined_call_operand.vmem [shape: f32[16,32], index: 1, kind: output, shape index: {}]  }
   0x1   :  { %v4_v0 = vld [vmem:[%s28_s0] ss:$0 sm:$0xff] }
   0x2   :  { %5 = vst [vmem:[%s29_s1] sm:$0xff] %v4_v0  ;;  %8 = vst [vmem:[%s29_s1 + $0x8] sm:$0xff] %v4_v0 }

// kernel: tile.14
= control target key start
LH: loop header
LB: loop body
LE: loop exit
PB: predicated region body
PF: predicated region fallthrough
CT: control target
= control target key end

     0   :  { %s57_s8 = smov 96   ;;  %vm3_vm0 = vcmask 261120   ;;  %s59_s15 = smov 64   ;;  %vm9_vm1 = vcmask 1048320   ;;  %vm15_vm2 = vcmask 785920   ;;  %vm21_vm3 = vcmask 523520   ;;  %s94_s0 = inlined_call_operand.vmem [shape: f32[16,32], index: 0, kind: input, shape index: {}]   ;;  %s95_s1 = inlined_call_operand.vmem [shape: f32[1,512], index: 1, kind: output, shape index: {}]  }
   0x1   :  { %v48_v0 = vld [vmem:[%s94_s0 + $0x3] ss:$4 sm:$0xf]   ;;  %v49_v1 = vld [vmem:[%s94_s0 + $0x2] ss:$4 sm:$0xf]  }
   0x2   :  { %7 = vrot.lane.b32.xlu0 %v48_v0, %s57_s8  ;;  %v50_v2 = vld [vmem:[%s94_s0 + $0x1] ss:$4 sm:$0xf]   ;;  %v2_v3 = vld [vmem:[%s94_s0] ss:$4 sm:$0xf]  }
   0x3   :  { %s58_s0 = smov 32   ;;  %4 = vst.msk [vmem:[#allocation0] ss:$8 sm:$0xf] %vm3_vm0, %v2_v3  }
   0x4   :  { %19 = vrot.lane.b32.xlu1 %v50_v2, %s58_s0 }
   0x6   :  { %13 = vrot.lane.b32.xlu0 %v49_v1, %s59_s15 }
  0x74   :  { %v8_v4 = vpop.permute.xlu0 %7  }
  0x75   :  { %10 = vst.msk [vmem:[#allocation0] ss:$8 sm:$0xf] %vm9_vm1, %v8_v4  }
  0x76   :  { %v20_v5 = vpop.permute.xlu1 %19  }
  0x78   :  { %v14_v6 = vpop.permute.xlu0 %13  }
  0x79   :  { %16 = vst.msk [vmem:[#allocation0] ss:$8 sm:$0xf] %vm15_vm2, %v14_v6  }
  0x7a   :  { %22 = vst.msk [vmem:[#allocation0] ss:$8 sm:$0xf] %vm21_vm3, %v20_v5  }
  0x81   :  { %v26_v7 = vld [vmem:[#allocation0] sm:$0x1]  ;;  %v30_v8 = vld [vmem:[#allocation0 + $0x8] sm:$0x1]  ;;  %v35_v9 = vld [vmem:[#allocation0 + $0x10] sm:$0x1] }
  0x82   :  { %28 = vst [vmem:[%s95_s1] sm:$0x1] %v26_v7  ;;  %51 = vst [vmem:[%s95_s1 + $0x1] sm:$0x1] %v30_v8  ;;  %v41_v10 = vld [vmem:[#allocation0 + $0x18] sm:$0x1] }
  0x83   :  { %52 = vst [vmem:[%s95_s1 + $0x2] sm:$0x1] %v35_v9  ;;  %53 = vst [vmem:[%s95_s1 + $0x3] sm:$0x1] %v41_v10 }

// kernel: tile.18
= control target key start
LH: loop header
LB: loop body
LE: loop exit
PB: predicated region body
PF: predicated region fallthrough
CT: control target
= control target key end

     0   :  { %s28_s0 = inlined_call_operand.vmem [shape: f32[3], index: 0, kind: input, shape index: {}]   ;;  %s29_s1 = inlined_call_operand.vmem [shape: f32[16,3], index: 1, kind: output, shape index: {}]  }
   0x1   :  { %v4_v0 = vld [vmem:[%s28_s0] ss:$0 sm:$0xff] }
   0x2   :  { %5 = vst [vmem:[%s29_s1] sm:$0xff] %v4_v0  ;;  %8 = vst [vmem:[%s29_s1 + $0x8] sm:$0xff] %v4_v0 }

// kernel: tile.19
= control target key start
LH: loop header
LB: loop body
LE: loop exit
PB: predicated region body
PF: predicated region fallthrough
CT: control target
= control target key end

     0   :  { %s131_s10 = smov 45   ;;  %s132_s11 = smov 39   ;;  %vm3_vm0 = vcmask 23552   ;;  %vm9_vm1 = vcmask 392552   ;;  %vm15_vm2 = vcmask 367952   ;;  %vm21_vm3 = vcmask 343352   ;;  %s207_s0 = inlined_call_operand.vmem [shape: f32[16,3], index: 0, kind: input, shape index: {}]   ;;  %s208_s1 = inlined_call_operand.vmem [shape: f32[48], index: 1, kind: output, shape index: {}]  }
   0x1   :  { %v101_v0 = vld [vmem:[%s207_s0 + $0xf] sm:$0x1]   ;;  %v103_v1 = vld [vmem:[%s207_s0 + $0xd] sm:$0x1]   ;;  %v102_v2 = vld [vmem:[%s207_s0 + $0xe] sm:$0x1]  }
   0x2   :  { %7 = vrot.lane.b32.xlu0 %v101_v0, %s131_s10  ;;  %19 = vrot.lane.b32.xlu1 %v103_v1, %s132_s11  ;;  %v104_v3 = vld [vmem:[%s207_s0 + $0xc] sm:$0x1]   ;;  %s133_s16 = smov 42   ;;  %s134_s17 = smov 36   ;;  %v105_v4 = vld [vmem:[%s207_s0 + $0xb] sm:$0x1]  }
   0x3   :  { %v106_v5 = vld [vmem:[%s207_s0 + $0xa] sm:$0x1]   ;;  %v2_v6 = vld [vmem:[%s207_s0] sm:$0x1]   ;;  %s135_s24 = smov 33   ;;  %s136_s25 = smov 30  }
   0x4   :  { %4 = vst.msk [vmem:[#allocation0] sm:$0x1] %vm3_vm0, %v2_v6   ;;  %v107_v7 = vld [vmem:[%s207_s0 + $0x9] sm:$0x1]   ;;  %v108_v8 = vld [vmem:[%s207_s0 + $0x8] sm:$0x1]  }
   0x5   :  { %s137_s30 = smov 27   ;;  %s138_s2 = smov 24   ;;  %v109_v9 = vld [vmem:[%s207_s0 + $0x7] sm:$0x1]   ;;  %v110_v10 = vld [vmem:[%s207_s0 + $0x6] sm:$0x1]  }
   0x6   :  { %13 = vrot.lane.b32.xlu0 %v102_v2, %s133_s16  ;;  %25 = vrot.lane.b32.xlu1 %v104_v3, %s134_s17  ;;  %s139_s7 = smov 21   ;;  %s140_s8 = smov 18   ;;  %v111_v11 = vld [vmem:[%s207_s0 + $0x5] sm:$0x1]   ;;  %v112_v12 = vld [vmem:[%s207_s0 + $0x4] sm:$0x1]  }
   0x7   :  { %s141_s13 = smov 15   ;;  %s142_s14 = smov 12   ;;  %v113_v13 = vld [vmem:[%s207_s0 + $0x3] sm:$0x1]   ;;  %v114_v14 = vld [vmem:[%s207_s0 + $0x2] sm:$0x1]  }
   0x8   :  { %s143_s19 = smov 9   ;;  %s144_s20 = smov 6   ;;  %v115_v15 = vld [vmem:[%s207_s0 + $0x1] sm:$0x1]   ;;  %vm27_vm4 = vcmask 318752   ;;  %vm33_vm5 = vcmask 294152  }
   0x9   :  { %s145_s0 = smov 3   ;;  %vm39_vm6 = vcmask 269552   ;;  %vm45_vm7 = vcmask 244952   ;;  %vm51_vm8 = vcmask 220352   ;;  %vm57_vm9 = vcmask 195752  }
   0xa   :  { %31 = vrot.lane.b32.xlu0 %v105_v4, %s135_s24  ;;  %37 = vrot.lane.b32.xlu1 %v106_v5, %s136_s25  ;;  %vm63_vm10 = vcmask 171152   ;;  %vm69_vm11 = vcmask 146552   ;;  %vm75_vm12 = vcmask 121952   ;;  %vm81_vm13 = vcmask 97352  }
   0xb   :  { %vm87_vm14 = vcmask 72752   ;;  %vm93_vm15 = vcmask 48152  }
   0xe   :  { %43 = vrot.lane.b32.xlu0 %v107_v7, %s137_s30  ;;  %49 = vrot.lane.b32.xlu1 %v108_v8, %s138_s2 }
  0x12   :  { %55 = vrot.lane.b32.xlu0 %v109_v9, %s139_s7  ;;  %61 = vrot.lane.b32.xlu1 %v110_v10, %s140_s8 }
  0x16   :  { %67 = vrot.lane.b32.xlu0 %v111_v11, %s141_s13  ;;  %73 = vrot.lane.b32.xlu1 %v112_v12, %s142_s14 }
  0x1a   :  { %79 = vrot.lane.b32.xlu0 %v113_v13, %s143_s19  ;;  %85 = vrot.lane.b32.xlu1 %v114_v14, %s144_s20 }
  0x1e   :  { %91 = vrot.lane.b32.xlu0 %v115_v15, %s145_s0 }
  0x74   :  { %v8_v16 = vpop.permute.xlu0 %7   ;;  %v20_v17 = vpop.permute.xlu1 %19  }
  0x75   :  { %10 = vst.msk [vmem:[#allocation0] sm:$0x1] %vm9_vm1, %v8_v16  }
  0x78   :  { %v14_v18 = vpop.permute.xlu0 %13   ;;  %v26_v19 = vpop.permute.xlu1 %25  }
  0x79   :  { %16 = vst.msk [vmem:[#allocation0] sm:$0x1] %vm15_vm2, %v14_v18  }
  0x7a   :  { %22 = vst.msk [vmem:[#allocation0] sm:$0x1] %vm21_vm3, %v20_v17  }
  0x7b   :  { %28 = vst.msk [vmem:[#allocation0] sm:$0x1] %vm27_vm4, %v26_v19  }
  0x7c   :  { %v32_v20 = vpop.permute.xlu0 %31   ;;  %v38_v21 = vpop.permute.xlu1 %37  }
  0x7d   :  { %34 = vst.msk [vmem:[#allocation0] sm:$0x1] %vm33_vm5, %v32_v20  }
  0x7e   :  { %40 = vst.msk [vmem:[#allocation0] sm:$0x1] %vm39_vm6, %v38_v21  }
  0x80   :  { %v44_v22 = vpop.permute.xlu0 %43   ;;  %v50_v23 = vpop.permute.xlu1 %49  }
  0x81   :  { %46 = vst.msk [vmem:[#allocation0] sm:$0x1] %vm45_vm7, %v44_v22  }
  0x82   :  { %52 = vst.msk [vmem:[#allocation0] sm:$0x1] %vm51_vm8, %v50_v23  }
  0x84   :  { %v56_v24 = vpop.permute.xlu0 %55   ;;  %v62_v25 = vpop.permute.xlu1 %61  }
  0x85   :  { %58 = vst.msk [vmem:[#allocation0] sm:$0x1] %vm57_vm9, %v56_v24  }
  0x86   :  { %64 = vst.msk [vmem:[#allocation0] sm:$0x1] %vm63_vm10, %v62_v25  }
  0x88   :  { %v68_v26 = vpop.permute.xlu0 %67   ;;  %v74_v27 = vpop.permute.xlu1 %73  }
  0x89   :  { %70 = vst.msk [vmem:[#allocation0] sm:$0x1] %vm69_vm11, %v68_v26  }
  0x8a   :  { %76 = vst.msk [vmem:[#allocation0] sm:$0x1] %vm75_vm12, %v74_v27  }
  0x8c   :  { %v80_v28 = vpop.permute.xlu0 %79   ;;  %v86_v29 = vpop.permute.xlu1 %85  }
  0x8d   :  { %82 = vst.msk [vmem:[#allocation0] sm:$0x1] %vm81_vm13, %v80_v28  }
  0x8e   :  { %88 = vst.msk [vmem:[#allocation0] sm:$0x1] %vm87_vm14, %v86_v29  }
  0x90   :  { %v92_v30 = vpop.permute.xlu0 %91  }
  0x91   :  { %94 = vst.msk [vmem:[#allocation0] sm:$0x1] %vm93_vm15, %v92_v30  }
  0x98   :  { %v98_v31 = vld [vmem:[#allocation0] sm:$0x1] }
  0x99   :  { %100 = vst [vmem:[%s208_s1] sm:$0x1] %v98_v31 }

// kernel: generator_forward.1
= control target key start
LH: loop header
LB: loop body
LE: loop exit
PB: predicated region body
PF: predicated region fallthrough
CT: control target
= control target key end

     0   :  { %s3687_s29 = smov 0   ;;  %s4702_s0 = inlined_call_operand.vmem [shape: f32[16,32], index: 0, kind: input, shape index: {}]   ;;  %s4703_s1 = inlined_call_operand.vmem [shape: bf16[32,32], index: 1, kind: input, shape index: {}]   ;;  %s4704_s2 = inlined_call_operand.vmem [shape: f32[1,32], index: 2, kind: input, shape index: {}]   ;;  %s4705_s3 = inlined_call_operand.vmem [shape: bf16[32,32], index: 3, kind: input, shape index: {}]   ;;  %s4706_s4 = inlined_call_operand.vmem [shape: f32[1,32], index: 4, kind: input, shape index: {}]   ;;  %s4707_s5 = inlined_call_operand.vmem [shape: f32[1,512], index: 5, kind: input, shape index: {}]   ;;  %s4708_s6 = inlined_call_operand.vmem [shape: bf16[512,512], index: 6, kind: input, shape index: {}]   ;;  %s4709_s7 = inlined_call_operand.vmem [shape: f32[1,512], index: 7, kind: input, shape index: {}]   ;;  %s4710_s8 = inlined_call_operand.vmem [shape: bf16[32,64], index: 8, kind: input, shape index: {}]   ;;  %s4711_s9 = inlined_call_operand.vmem [shape: f32[1,64], index: 9, kind: input, shape index: {}]   ;;  %s4712_s10 = inlined_call_operand.vmem [shape: f32[512,32], index: 10, kind: input, shape index: {}]   ;;  %s4713_s11 = inlined_call_operand.vmem [shape: f32[32,512], index: 11, kind: input, shape index: {}]   ;;  %s4714_s12 = inlined_call_operand.vmem [shape: bf16[512,128], index: 12, kind: input, shape index: {}]   ;;  %s4715_s13 = inlined_call_operand.vmem [shape: f32[1,128], index: 13, kind: input, shape index: {}]   ;;  %s4716_s14 = inlined_call_operand.vmem [shape: f32[16,128], index: 14, kind: output, shape index: {}]  }
   0x1 LB: > { %s2777_s30 = sadd.s32 4294967295, %s3606_s29   ;;  %p2781_p0 = scmp.ge.s32.totalorder %s3606_s29, 1  ;;  %s3606_s29 = sphi %s3687_s29, %s24_s29  }
   0x2   : > { %p411_p1 = scmp.lt.s32.totalorder %s3606_s29, 3 }
   0x4   : > { %p412_p2 = pnand %p2781_p0, %p411_p1 }
   0x5   : > { %p455_p3 = scmp.lt.s32.totalorder (!%p412_p2), %s2777_s30, 1  ;;  %vm466_vm0 = vcmask (!%p412_p2), 261120   ;;  %v3364_v3 = vld [vmem:[%s4703_s1] sm:$0xff] (!%p412_p2)   ;;  %v3365_v4 = vld [vmem:[%s4703_s1 + $0x8] sm:$0xff] (!%p412_p2)   ;;  %v3608_v5 = vmov (!%p412_p2), 0.0   ;;  %vm3609_vm1 = vmmov (!%p412_p2), 0   ;;  %v745_v9 = vlaneseq (!%p412_p2) }
   0x6   : > { %415 = sbr.rel (%p412_p2) target bundleno = 1700 (0x6a4), region = 76  ;;  %3156 = vmatprep.subr.bf16.mxu0 (!%p412_p2), %v3608_v5  ;;  %3160 = vmatprep.mubr.msk.bf16.mxu0 (!%p412_p2), %vm3609_vm1, %v3608_v5  ;;  %v3368_v6 = vld [vmem:[%s4708_s6 + $0x4] ss:$16 sps:$4 sm:$0xff] (!%p412_p2)   ;;  %v3726_v13 = vld [vmem:[%s4707_s5] sm:$0xf] (!%p412_p2)  ;;  %s3610_s28 = smov (!%p412_p2), 32  }
   0x7   : > { %3157 = vmatpush3.bf16.msra.mxu0 (!%p412_p2), %v3364_v3  ;;  %3164 = vmatprep.subr.bf16.mxu1 (!%p412_p2), %v3608_v5  ;;  %v3720_v11 = vshrl.u32 (!%p412_p2), %v745_v9, 7  ;;  %v3366_v17 = vld [vmem:[%s4708_s6] ss:$16 sps:$4 sm:$0xff] (!%p412_p2)   ;;  %v3371_v20 = vld [vmem:[%s4708_s6 + $0x24] ss:$16 sps:$4 sm:$0xff] (!%p412_p2)   ;;  %s3611_s20 = smov (!%p412_p2), 96  }
   0x8   : > { %3158 = vmatprep.subr.bf16.mxu0 (!%p412_p2), %v3608_v5  ;;  %3168 = vmatprep.mubr.msk.bf16.mxu1 (!%p412_p2), %vm3609_vm1, %v3608_v5  ;;  %v3369_v21 = vld [vmem:[%s4708_s6 + $0x20] ss:$16 sps:$4 sm:$0xff] (!%p412_p2)   ;;  %v3374_v22 = vld [vmem:[%s4708_s6 + $0x44] ss:$16 sps:$4 sm:$0xff] (!%p412_p2)  }
   0x9   : > { %v751_v12 = vsub.s32 (!%p412_p2), 1, %v3720_v11  ;;  %v3372_v23 = vld [vmem:[%s4708_s6 + $0x40] ss:$16 sps:$4 sm:$0xff] (!%p412_p2)   ;;  %v3377_v24 = vld [vmem:[%s4708_s6 + $0x64] ss:$16 sps:$4 sm:$0xff] (!%p412_p2)   ;;  %v3820_v47 = vsub.s32 (!%p412_p2), 0, %v3720_v11 }
   0xa   : > { %v3375_v25 = vld [vmem:[%s4708_s6 + $0x60] ss:$16 sps:$4 sm:$0xff] (!%p412_p2)   ;;  %v3380_v26 = vld [vmem:[%s4708_s6 + $0x84] ss:$16 sps:$4 sm:$0xff] (!%p412_p2)   ;;  %v759_v49 = vsub.s32 (!%p412_p2), 3, %v3720_v11 }
   0xb   : > { %3159 = vmatpush3.bf16.msra.mxu0 (!%p412_p2), %v3365_v4  ;;  %v752_v14 = vrot.slane (!%p412_p2), %v3726_v13, %v751_v12  ;;  %v3378_v27 = vld [vmem:[%s4708_s6 + $0x80] ss:$16 sps:$4 sm:$0xff] (!%p412_p2)   ;;  %v3383_v28 = vld [vmem:[%s4708_s6 + $0xa4] ss:$16 sps:$4 sm:$0xff] (!%p412_p2)   ;;  %v748_v51 = vrot.slane (!%p412_p2), %v3726_v13, %v3820_v47 }
   0xc   : > { %1431 = vmatprep.subr.bf16.mxu0 (!%p412_p2), %v3368_v6  ;;  %v3381_v29 = vld [vmem:[%s4708_s6 + $0xa0] ss:$16 sps:$4 sm:$0xff] (!%p412_p2)   ;;  %v3386_v30 = vld [vmem:[%s4708_s6 + $0xc4] ss:$16 sps:$4 sm:$0xff] (!%p412_p2)   ;;  %v760_v53 = vrot.slane (!%p412_p2), %v3726_v13, %v759_v49 }
   0xd   : > { %s4718_s30 = smov (!%p455_p3, %s2777_s30), 1  ;;  %v3734_v18 = vpack.c.bf16 %v752_v14, %v752_v14  ;;  %v3384_v31 = vld [vmem:[%s4708_s6 + $0xc0] ss:$16 sps:$4 sm:$0xff]   ;;  %v3389_v32 = vld [vmem:[%s4708_s6 + $0xe4] ss:$16 sps:$4 sm:$0xff]   ;;  %v3840_v55 = vpack.c.bf16 %v748_v51, %v748_v51 }
   0xe   : > { %s2782_s15 = sshll.u32 %s4718_s30, 3  ;;  %v3387_v33 = vld [vmem:[%s4708_s6 + $0xe0] ss:$16 sps:$4 sm:$0xff]   ;;  %v3392_v34 = vld [vmem:[%s4708_s6 + $0x104] ss:$16 sps:$4 sm:$0xff]   ;;  %v3845_v57 = vpack.c.bf16 %v760_v53, %v760_v53  ;;  %v1608_v53 = vld [vmem:[%s4712_s10 + $0x8] sm:$0xff] }
   0xf   : > { %s458_s18 = scalar_lea.vmem %s4702_s0, %s2782_s15  ;;  %v3390_v35 = vld [vmem:[%s4708_s6 + $0x100] ss:$16 sps:$4 sm:$0xff]   ;;  %v3395_v36 = vld [vmem:[%s4708_s6 + $0x124] ss:$16 sps:$4 sm:$0xff]  }
  0x10   : > { %v464_v0 = vld [vmem:[%s458_s18] sm:$0xff] }
  0x11   : > { %v465_v1 = vmul.f32 %v464_v0, %v464_v0  ;;  %v3393_v37 = vld [vmem:[%s4708_s6 + $0x120] ss:$16 sps:$4 sm:$0xff]   ;;  %v3398_v38 = vld [vmem:[%s4708_s6 + $0x144] ss:$16 sps:$4 sm:$0xff]  }
  0x12   : > { %v3396_v39 = vld [vmem:[%s4708_s6 + $0x140] ss:$16 sps:$4 sm:$0xff]   ;;  %v3401_v40 = vld [vmem:[%s4708_s6 + $0x164] ss:$16 sps:$4 sm:$0xff]  }
  0x13   : > { %v467_v2 = vsel %vm466_vm0, %v465_v1, 0.0  ;;  %v3399_v41 = vld [vmem:[%s4708_s6 + $0x160] ss:$16 sps:$4 sm:$0xff]   ;;  %v3404_v42 = vld [vmem:[%s4708_s6 + $0x184] ss:$16 sps:$4 sm:$0xff]  }
  0x14   : > { %468 = vadd.xlane.f32.xlu0 %v467_v2  ;;  %v3402_v43 = vld [vmem:[%s4708_s6 + $0x180] ss:$16 sps:$4 sm:$0xff]   ;;  %v3407_v44 = vld [vmem:[%s4708_s6 + $0x1a4] ss:$16 sps:$4 sm:$0xff]  }
  0x15   : > { %v3405_v45 = vld [vmem:[%s4708_s6 + $0x1a0] ss:$16 sps:$4 sm:$0xff]   ;;  %v3410_v46 = vld [vmem:[%s4708_s6 + $0x1c4] ss:$16 sps:$4 sm:$0xff]  }
  0x16   : > { %v3408_v48 = vld [vmem:[%s4708_s6 + $0x1c0] ss:$16 sps:$4 sm:$0xff]   ;;  %v3413_v50 = vld [vmem:[%s4708_s6 + $0x1e4] ss:$16 sps:$4 sm:$0xff]  }
  0x17   : > { %v3411_v52 = vld [vmem:[%s4708_s6 + $0x1e0] ss:$16 sps:$4 sm:$0xff]   ;;  %v3416_v54 = vld [vmem:[%s4708_s6 + $0x204] ss:$16 sps:$4 sm:$0xff]  }
  0x18   : > { %v3414_v56 = vld [vmem:[%s4708_s6 + $0x200] ss:$16 sps:$4 sm:$0xff]   ;;  %v3419_v58 = vld [vmem:[%s4708_s6 + $0x224] ss:$16 sps:$4 sm:$0xff]  }
  0x19   : > { %v3417_v59 = vld [vmem:[%s4708_s6 + $0x220] ss:$16 sps:$4 sm:$0xff]   ;;  %v3422_v60 = vld [vmem:[%s4708_s6 + $0x244] ss:$16 sps:$4 sm:$0xff]  }
  0x1a   : > { %v3420_v61 = vld [vmem:[%s4708_s6 + $0x240] ss:$16 sps:$4 sm:$0xff]   ;;  %v3425_v62 = vld [vmem:[%s4708_s6 + $0x264] ss:$16 sps:$4 sm:$0xff]  }
  0x1b   : > { %v3423_v63 = vld [vmem:[%s4708_s6 + $0x260] ss:$16 sps:$4 sm:$0xff]   ;;  %v3431_v2 = vld [vmem:[%s4708_s6 + $0x2a4] ss:$16 sps:$4 sm:$0xff]  }
  0x1c   : > { %v3426_v1 = vld [vmem:[%s4708_s6 + $0x280] ss:$16 sps:$4 sm:$0xff]   ;;  %v3434_v6 = vld [vmem:[%s4708_s6 + $0x2c4] ss:$16 sps:$4 sm:$0xff]  }
  0x1d   : > { %v3429_v3 = vld [vmem:[%s4708_s6 + $0x2a0] ss:$16 sps:$4 sm:$0xff]   ;;  %v3437_v9 = vld [vmem:[%s4708_s6 + $0x2e4] ss:$16 sps:$4 sm:$0xff]  }
  0x1e   : > { %v3462_v4 = vld [vmem:[%s4705_s3] sm:$0xff]  }
  0x1f   : > { %3165 = vmatpush3.bf16.msra.mxu1 %v3462_v4  ;;  %v3435_v14 = vld [vmem:[%s4708_s6 + $0x2e0] ss:$16 sps:$4 sm:$0xff]   ;;  %v3475_v4 = vld [vmem:[%s4708_s6 + $0x6c] ss:$16 sps:$4 sm:$0xff]  }
  0x20   : > { %3166 = vmatprep.subr.bf16.mxu1 %v3608_v5  ;;  %v1607_v51 = vld [vmem:[%s4712_s10] sm:$0xff] }
  0xa1   : > { %v469_v7 = vpop.xlane.xlu0 %468 }
  0xa2   : > { %v471_v8 = vmul.f32 0.03125, %v469_v7  ;;  %v3432_v7 = vld [vmem:[%s4708_s6 + $0x2c0] ss:$16 sps:$4 sm:$0xff]  }
  0xa4   : > { %v472_v10 = vadd.f32 1e-08, %v471_v8  ;;  %v3463_v8 = vld [vmem:[%s4705_s3 + $0x8] sm:$0xff]  }
  0xa5   : > { %3167 = vmatpush3.bf16.msra.mxu1 %v3463_v8 }
  0xa6   : > { %3594 = vrsqrt.f32 %v472_v10  ;;  %v3466_v10 = vld [vmem:[%s4708_s6 + $0xc] ss:$16 sps:$4 sm:$0xff]  }
  0xa7   : > { %1513 = vmatprep.subr.bf16.mxu1 %v3466_v10 }
  0xb0   : > { %v3595_v15 = vpop.eup %3594 }
  0xb1   : > { %v474_v16 = vmul.f32 %v3595_v15, %v464_v0  ;;  %v3428_v0 = vld [vmem:[%s4708_s6 + $0x284] ss:$16 sps:$4 sm:$0xff]  }
  0xb2   : > { %v3440_v15 = vld [vmem:[%s4708_s6 + $0x304] ss:$16 sps:$4 sm:$0xff]  }
  0xb3   : > { %v479_v19 = vpack.c.bf16 %v474_v16, %v474_v16  ;;  %v3438_v16 = vld [vmem:[%s4708_s6 + $0x300] ss:$16 sps:$4 sm:$0xff]  }
  0xb5   : > { %3161 = vmatmul.mubr.msk.bf16.vlgmr.msra.gmra.mrb[0].mxu0 %vm466_vm0, %v479_v19  ;;  %v3441_v19 = vld [vmem:[%s4708_s6 + $0x320] ss:$16 sps:$4 sm:$0xff]  }
  0xb6   : > { %1432 = vmatpush1.bf16.msra.mxu0 %v3366_v17  ;;  %1463 = vmatprep.mubr.bf16.mxu0 %v3734_v18  ;;  %v3443_v17 = vld [vmem:[%s4708_s6 + $0x324] ss:$16 sps:$4 sm:$0xff]  }
  0xb7   : > { %1433 = vmatprep.subr.bf16.mxu0 %v3371_v20  ;;  %v3446_v20 = vld [vmem:[%s4708_s6 + $0x344] ss:$16 sps:$4 sm:$0xff]  }
  0xba   : > { %1434 = vmatpush1.bf16.msra.mxu0 %v3369_v21  ;;  %v3444_v21 = vld [vmem:[%s4708_s6 + $0x340] ss:$16 sps:$4 sm:$0xff]  }
  0xbb   : > { %1435 = vmatprep.subr.bf16.mxu0 %v3374_v22  ;;  %v3449_v22 = vld [vmem:[%s4708_s6 + $0x364] ss:$16 sps:$4 sm:$0xff]  }
  0xbe   : > { %1436 = vmatpush1.bf16.msra.mxu0 %v3372_v23  ;;  %v3447_v23 = vld [vmem:[%s4708_s6 + $0x360] ss:$16 sps:$4 sm:$0xff]  }
  0xbf   : > { %1437 = vmatprep.subr.bf16.mxu0 %v3377_v24  ;;  %v3452_v24 = vld [vmem:[%s4708_s6 + $0x384] ss:$16 sps:$4 sm:$0xff]  }
  0xc2   : > { %1438 = vmatpush1.bf16.msra.mxu0 %v3375_v25  ;;  %v3450_v25 = vld [vmem:[%s4708_s6 + $0x380] ss:$16 sps:$4 sm:$0xff]  }
  0xc3   : > { %1439 = vmatprep.subr.bf16.mxu0 %v3380_v26  ;;  %v3455_v26 = vld [vmem:[%s4708_s6 + $0x3a4] ss:$16 sps:$4 sm:$0xff]  }
  0xc6   : > { %1440 = vmatpush1.bf16.msra.mxu0 %v3378_v27  ;;  %v3453_v27 = vld [vmem:[%s4708_s6 + $0x3a0] ss:$16 sps:$4 sm:$0xff]  }
  0xc7   : > { %1441 = vmatprep.subr.bf16.mxu0 %v3383_v28  ;;  %v3458_v28 = vld [vmem:[%s4708_s6 + $0x3c4] ss:$16 sps:$4 sm:$0xff]  }
  0xca   : > { %1442 = vmatpush1.bf16.msra.mxu0 %v3381_v29  ;;  %v755_v29 = vsub.s32 2, %v3720_v11 }
  0xcb   : > { %1443 = vmatprep.subr.bf16.mxu0 %v3386_v30  ;;  %v3456_v30 = vld [vmem:[%s4708_s6 + $0x3c0] ss:$16 sps:$4 sm:$0xff]  }
  0xce   : > { %1444 = vmatpush1.bf16.msra.mxu0 %v3384_v31  ;;  %v3461_v31 = vld [vmem:[%s4708_s6 + $0x3e4] ss:$16 sps:$4 sm:$0xff]  }
  0xcf   : > { %1445 = vmatprep.subr.bf16.mxu0 %v3389_v32  ;;  %v756_v32 = vrot.slane %v3726_v13, %v755_v29 }
  0xd2   : > { %1446 = vmatpush1.bf16.msra.mxu0 %v3387_v33  ;;  %v3459_v33 = vld [vmem:[%s4708_s6 + $0x3e0] ss:$16 sps:$4 sm:$0xff]  }
  0xd3   : > { %1447 = vmatprep.subr.bf16.mxu0 %v3392_v34  ;;  %v3953_v34 = vpack.c.bf16 %v756_v32, %v756_v32  ;;  %v1617_v32 = vld [vmem:[%s4712_s10 + $0x50] sm:$0xff] }
  0xd6   : > { %1448 = vmatpush1.bf16.msra.mxu0 %v3390_v35  ;;  %v2784_v35 = vld [vmem:[%s4704_s2] ss:$0 sm:$0xff] }
  0xd7   : > { %1449 = vmatprep.subr.bf16.mxu0 %v3395_v36 }
  0xda   : > { %1450 = vmatpush1.bf16.msra.mxu0 %v3393_v37 }
  0xdb   : > { %1451 = vmatprep.subr.bf16.mxu0 %v3398_v38 }
  0xde   : > { %1452 = vmatpush1.bf16.msra.mxu0 %v3396_v39 }
  0xdf   : > { %1453 = vmatprep.subr.bf16.mxu0 %v3401_v40 }
  0xe2   : > { %1454 = vmatpush1.bf16.msra.mxu0 %v3399_v41 }
  0xe3   : > { %1455 = vmatprep.subr.bf16.mxu0 %v3404_v42  ;;  %v3464_v42 = vld [vmem:[%s4708_s6 + $0x8] ss:$16 sps:$4 sm:$0xff]  }
  0xe6   : > { %1456 = vmatpush1.bf16.msra.mxu0 %v3402_v43 }
  0xe7   : > { %1457 = vmatprep.subr.bf16.mxu0 %v3407_v44  ;;  %v3469_v44 = vld [vmem:[%s4708_s6 + $0x2c] ss:$16 sps:$4 sm:$0xff]  }
  0xea   : > { %1458 = vmatpush1.bf16.msra.mxu0 %v3405_v45  ;;  %v3467_v45 = vld [vmem:[%s4708_s6 + $0x28] ss:$16 sps:$4 sm:$0xff]  }
  0xeb   : > { %1459 = vmatprep.subr.bf16.mxu0 %v3410_v46  ;;  %v3472_v46 = vld [vmem:[%s4708_s6 + $0x4c] ss:$16 sps:$4 sm:$0xff]  }
  0xee   : > { %1460 = vmatpush1.bf16.msra.mxu0 %v3408_v48  ;;  %v1623_v48 = vld [vmem:[%s4712_s10 + $0x80] sm:$0xff] }
  0xef   : > { %1461 = vmatprep.subr.bf16.mxu0 %v3413_v50  ;;  %v1624_v50 = vld [vmem:[%s4712_s10 + $0x88] sm:$0xff] }
  0xf2   : > { %1462 = vmatpush1.bf16.msra.mxu0 %v3411_v52  ;;  %v3982_v52 = vpack.c.bf16 %v1624_v50, %v1623_v48  ;;  %v1621_v50 = vld [vmem:[%s4712_s10 + $0x70] sm:$0xff] }
  0xf3   : > { %1472 = vmatprep.subr.bf16.mxu0 %v3416_v54  ;;  %v1625_v54 = vld [vmem:[%s4712_s10 + $0x90] sm:$0xff] }
  0xf5   : > { %1464 = vmatmul.mubr.bf16.vlgmr.msra.gmra.mrb[4].mxu0 %v3840_v55 }
  0xf6   : > { %1473 = vmatpush1.bf16.msra.mxu0 %v3414_v56  ;;  %1504 = vmatprep.mubr.bf16.mxu0 %v3845_v57  ;;  %v1626_v56 = vld [vmem:[%s4712_s10 + $0x98] sm:$0xff] }
  0xf7   : > { %1474 = vmatprep.subr.bf16.mxu0 %v3419_v58  ;;  %v3993_v58 = vpack.c.bf16 %v1608_v53, %v1607_v51  ;;  %v1622_v51 = vld [vmem:[%s4712_s10 + $0x78] sm:$0xff] }
  0xf8   : > { %v3490_v53 = vld [vmem:[%s4708_s6 + $0x10c] ss:$16 sps:$4 sm:$0xff]  }
  0xfa   : > { %1475 = vmatpush1.bf16.msra.mxu0 %v3417_v59  ;;  %v3995_v59 = vpack.c.bf16 %v1626_v56, %v1625_v54  ;;  %v4149_v54 = vpack.c.bf16 %v1622_v51, %v1621_v50  ;;  %v3488_v56 = vld [vmem:[%s4708_s6 + $0x108] ss:$16 sps:$4 sm:$0xff]   ;;  %v3550_v50 = vld [vmem:[%s4708_s6 + $0x38c] ss:$16 sps:$4 sm:$0xff]  }
  0xfb   : > { %1476 = vmatprep.subr.bf16.mxu0 %v3422_v60  ;;  %v1610_v60 = vld [vmem:[%s4712_s10 + $0x18] sm:$0xff] }
  0xfc   : > { %v3548_v51 = vld [vmem:[%s4708_s6 + $0x388] ss:$16 sps:$4 sm:$0xff]  }
  0xfe   : > { %1477 = vmatpush1.bf16.msra.mxu0 %v3420_v61  ;;  %v1627_v61 = vld [vmem:[%s4712_s10 + $0xa0] sm:$0xff] }
  0xff   : > { %1478 = vmatprep.subr.bf16.mxu0 %v3425_v62  ;;  %v1628_v62 = vld [vmem:[%s4712_s10 + $0xa8] sm:$0xff] }
 0x102   : > { %1479 = vmatpush1.bf16.msra.mxu0 %v3423_v63 }
 0x103   : > { %1480 = vmatprep.subr.bf16.mxu0 %v3428_v0  ;;  %v3470_v0 = vld [vmem:[%s4708_s6 + $0x48] ss:$16 sps:$4 sm:$0xff]  }
 0x106   : > { %1481 = vmatpush1.bf16.msra.mxu0 %v3426_v1  ;;  %v4017_v1 = vpack.c.bf16 %v1628_v62, %v1627_v61  ;;  %v3496_v61 = vld [vmem:[%s4708_s6 + $0x14c] ss:$16 sps:$4 sm:$0xff]   ;;  %v3494_v62 = vld [vmem:[%s4708_s6 + $0x148] ss:$16 sps:$4 sm:$0xff]  }
 0x107   : > { %1482 = vmatprep.subr.bf16.mxu0 %v3431_v2  ;;  %v1611_v2 = vld [vmem:[%s4712_s10 + $0x20] sm:$0xff] }
 0x10a   : > { %1483 = vmatpush1.bf16.msra.mxu0 %v3429_v3  ;;  %v1612_v3 = vld [vmem:[%s4712_s10 + $0x28] sm:$0xff] }
 0x10b   : > { %1484 = vmatprep.subr.bf16.mxu0 %v3434_v6  ;;  %v1629_v6 = vld [vmem:[%s4712_s10 + $0xb0] sm:$0xff]  ;;  %v4035_v8 = vpack.c.bf16 %v1612_v3, %v1611_v2  ;;  %v3502_v2 = vld [vmem:[%s4708_s6 + $0x18c] ss:$16 sps:$4 sm:$0xff]   ;;  %v3500_v3 = vld [vmem:[%s4708_s6 + $0x188] ss:$16 sps:$4 sm:$0xff]  }
 0x10e   : > { %1485 = vmatpush1.bf16.msra.mxu0 %v3432_v7  ;;  %v1630_v7 = vld [vmem:[%s4712_s10 + $0xb8] sm:$0xff] }
 0x10f   : > { %1486 = vmatprep.subr.bf16.mxu0 %v3437_v9  ;;  %v3473_v9 = vld [vmem:[%s4708_s6 + $0x68] ss:$16 sps:$4 sm:$0xff]   ;;  %v4041_v10 = vpack.c.bf16 %v1630_v7, %v1629_v6  ;;  %v3508_v7 = vld [vmem:[%s4708_s6 + $0x1cc] ss:$16 sps:$4 sm:$0xff]  }
 0x110   : > { %v3503_v6 = vld [vmem:[%s4708_s6 + $0x1a8] ss:$16 sps:$4 sm:$0xff]  }
 0x112   : > { %1487 = vmatpush1.bf16.msra.mxu0 %v3435_v14  ;;  %v1613_v14 = vld [vmem:[%s4712_s10 + $0x30] sm:$0xff] }
 0x113   : > { %1488 = vmatprep.subr.bf16.mxu0 %v3440_v15  ;;  %v1614_v15 = vld [vmem:[%s4712_s10 + $0x38] sm:$0xff] }
 0x116   : > { %1489 = vmatpush1.bf16.msra.mxu0 %v3438_v16  ;;  %v3478_v16 = vld [vmem:[%s4708_s6 + $0x8c] ss:$16 sps:$4 sm:$0xff]  }
 0x117   : > { %1490 = vmatprep.subr.bf16.mxu0 %v3443_v17  ;;  %v1631_v17 = vld [vmem:[%s4712_s10 + $0xc0] sm:$0xff] }
 0x11a   : > { %1491 = vmatpush1.bf16.msra.mxu0 %v3441_v19  ;;  %v1632_v19 = vld [vmem:[%s4712_s10 + $0xc8] sm:$0xff] }
 0x11b   : > { %1492 = vmatprep.subr.bf16.mxu0 %v3446_v20  ;;  %v4059_v20 = vpack.c.bf16 %v1614_v15, %v1613_v14  ;;  %v3511_v14 = vld [vmem:[%s4708_s6 + $0x1ec] ss:$16 sps:$4 sm:$0xff]   ;;  %v3509_v15 = vld [vmem:[%s4708_s6 + $0x1e8] ss:$16 sps:$4 sm:$0xff]  }
 0x11e   : > { %1493 = vmatpush1.bf16.msra.mxu0 %v3444_v21  ;;  %v3476_v21 = vld [vmem:[%s4708_s6 + $0x88] ss:$16 sps:$4 sm:$0xff]  }
 0x11f   : > { %1494 = vmatprep.subr.bf16.mxu0 %v3449_v22  ;;  %v4065_v22 = vpack.c.bf16 %v1632_v19, %v1631_v17  ;;  %v3512_v17 = vld [vmem:[%s4708_s6 + $0x208] ss:$16 sps:$4 sm:$0xff]   ;;  %v3517_v19 = vld [vmem:[%s4708_s6 + $0x22c] ss:$16 sps:$4 sm:$0xff]  }
 0x122   : > { %1495 = vmatpush1.bf16.msra.mxu0 %v3447_v23  ;;  %v1615_v23 = vld [vmem:[%s4712_s10 + $0x40] sm:$0xff] }
 0x123   : > { %1496 = vmatprep.subr.bf16.mxu0 %v3452_v24  ;;  %v1616_v24 = vld [vmem:[%s4712_s10 + $0x48] sm:$0xff] }
 0x126   : > { %1497 = vmatpush1.bf16.msra.mxu0 %v3450_v25  ;;  %v3481_v25 = vld [vmem:[%s4708_s6 + $0xac] ss:$16 sps:$4 sm:$0xff]  }
 0x127   : > { %1498 = vmatprep.subr.bf16.mxu0 %v3455_v26  ;;  %v1633_v26 = vld [vmem:[%s4712_s10 + $0xd0] sm:$0xff] }
 0x12a   : > { %1499 = vmatpush1.bf16.msra.mxu0 %v3453_v27  ;;  %v1634_v27 = vld [vmem:[%s4712_s10 + $0xd8] sm:$0xff] }
 0x12b   : > { %1500 = vmatprep.subr.bf16.mxu0 %v3458_v28  ;;  %v4083_v28 = vpack.c.bf16 %v1616_v24, %v1615_v23  ;;  %v3520_v23 = vld [vmem:[%s4708_s6 + $0x24c] ss:$16 sps:$4 sm:$0xff]   ;;  %v3518_v24 = vld [vmem:[%s4708_s6 + $0x248] ss:$16 sps:$4 sm:$0xff]  }
 0x12e   : > { %1501 = vmatpush1.bf16.msra.mxu0 %v3456_v30  ;;  %v3479_v30 = vld [vmem:[%s4708_s6 + $0xa8] ss:$16 sps:$4 sm:$0xff]  }
 0x12f   : > { %1502 = vmatprep.subr.bf16.mxu0 %v3461_v31  ;;  %v4089_v31 = vpack.c.bf16 %v1634_v27, %v1633_v26  ;;  %v3524_v26 = vld [vmem:[%s4708_s6 + $0x288] ss:$16 sps:$4 sm:$0xff]   ;;  %v3529_v27 = vld [vmem:[%s4708_s6 + $0x2ac] ss:$16 sps:$4 sm:$0xff]  }
 0x132   : > { %1503 = vmatpush1.bf16.msra.mxu0 %v3459_v33  ;;  %v1618_v33 = vld [vmem:[%s4712_s10 + $0x58] sm:$0xff] }
 0x133   : > { %3181 = vmatprep.subr.bf16.mxu0 %v3982_v52 }
 0x135   : > { %1505 = vmatmul.mubr.bf16.vlgmr.msra.gmra.mrb[4].mxu0 %v3953_v34 }
 0x136   : > { %3183 = vmatpush3.bf16.msra.mxu0 %v3993_v58 }
 0x137   : > { %3185 = vmatprep.subr.bf16.mxu0 %v3995_v59 }
 0x188   : > { %v536_v36 = vpop.f32.mrb[0].mxu0 }
 0x189   : > { %v537_v37 = vadd.f32 %v2784_v35, %v536_v36  ;;  %v3162_v38 = vpop.f32.mrb[1].mxu0  ;;  %v3484_v35 = vld [vmem:[%s4708_s6 + $0xcc] ss:$16 sps:$4 sm:$0xff]   ;;  %v1635_v36 = vld [vmem:[%s4712_s10 + $0xe0] sm:$0xff] }
 0x18a   : > { %v539_v39 = vpop.f32.mrb[2].mxu0  ;;  %v4107_v38 = vpack.c.bf16 %v1618_v33, %v1617_v32  ;;  %v3532_v32 = vld [vmem:[%s4708_s6 + $0x2cc] ss:$16 sps:$4 sm:$0xff]   ;;  %v3530_v33 = vld [vmem:[%s4708_s6 + $0x2c8] ss:$16 sps:$4 sm:$0xff]  }
 0x18b   : > { %vm542_vm2 = vcmp.ge.f32.partialorder %v537_v37, 0.0  ;;  %v543_v13 = vmul.f32 0.2, %v537_v37  ;;  %v3163_v40 = vpop.f32.mrb[3].mxu0  ;;  %v3482_v39 = vld [vmem:[%s4708_s6 + $0xc8] ss:$16 sps:$4 sm:$0xff]  }
 0x18c   : > { %v1619_v40 = vld [vmem:[%s4712_s10 + $0x60] sm:$0xff] }
 0x18d   : > { %v544_v41 = vsel %vm542_vm2, %v537_v37, %v543_v13  ;;  %v1636_v37 = vld [vmem:[%s4712_s10 + $0xe8] sm:$0xff] }
 0x18e   : > { %v549_v43 = vpack.c.bf16 %v544_v41, %v544_v41  ;;  %v4113_v13 = vpack.c.bf16 %v1636_v37, %v1635_v36  ;;  %v1620_v41 = vld [vmem:[%s4712_s10 + $0x68] sm:$0xff] }
 0x18f   : > { %v3533_v36 = vld [vmem:[%s4708_s6 + $0x2e8] ss:$16 sps:$4 sm:$0xff]   ;;  %v3538_v37 = vld [vmem:[%s4708_s6 + $0x30c] ss:$16 sps:$4 sm:$0xff]  }
 0x190   : > { %3169 = vmatmul.mubr.msk.bf16.vlgmr.msra.gmra.mrb[0].mxu1 %vm466_vm0, %v549_v43  ;;  %v1637_v43 = vld [vmem:[%s4712_s10 + $0xf0] sm:$0xff] }
 0x191   : > { %1514 = vmatpush1.bf16.msra.mxu1 %v3464_v42  ;;  %1545 = vmatprep.mubr.bf16.mxu1 %v3734_v18  ;;  %v1609_v18 = vld [vmem:[%s4712_s10 + $0x10] sm:$0xff]  ;;  %v3487_v42 = vld [vmem:[%s4708_s6 + $0xec] ss:$16 sps:$4 sm:$0xff]  }
 0x192   : > { %1515 = vmatprep.subr.bf16.mxu1 %v3469_v44  ;;  %v4011_v63 = vpack.c.bf16 %v1610_v60, %v1609_v18  ;;  %v1638_v44 = vld [vmem:[%s4712_s10 + $0xf8] sm:$0xff] }
 0x193   : > { %v4137_v48 = vpack.c.bf16 %v1638_v44, %v1637_v43  ;;  %v3493_v18 = vld [vmem:[%s4708_s6 + $0x12c] ss:$16 sps:$4 sm:$0xff]   ;;  %v3491_v60 = vld [vmem:[%s4708_s6 + $0x128] ss:$16 sps:$4 sm:$0xff]  }
 0x194   : > { %3187 = vmatpush3.bf16.msra.mxu0 %v4011_v63  ;;  %v3542_v43 = vld [vmem:[%s4708_s6 + $0x348] ss:$16 sps:$4 sm:$0xff]   ;;  %v3547_v44 = vld [vmem:[%s4708_s6 + $0x36c] ss:$16 sps:$4 sm:$0xff]  }
 0x195   : > { %1516 = vmatpush1.bf16.msra.mxu1 %v3467_v45  ;;  %3189 = vmatprep.subr.bf16.mxu0 %v4017_v1  ;;  %v4131_v45 = vpack.c.bf16 %v1620_v41, %v1619_v40  ;;  %v3541_v40 = vld [vmem:[%s4708_s6 + $0x32c] ss:$16 sps:$4 sm:$0xff]   ;;  %v3539_v41 = vld [vmem:[%s4708_s6 + $0x328] ss:$16 sps:$4 sm:$0xff]  }
 0x196   : > { %1517 = vmatprep.subr.bf16.mxu1 %v3472_v46  ;;  %v3485_v46 = vld [vmem:[%s4708_s6 + $0xe8] ss:$16 sps:$4 sm:$0xff]  }
 0x198   : > { %3191 = vmatpush3.bf16.msra.mxu0 %v4035_v8 }
 0x199   : > { %1518 = vmatpush1.bf16.msra.mxu1 %v3470_v0  ;;  %3193 = vmatprep.subr.bf16.mxu0 %v4041_v10  ;;  %v3499_v0 = vld [vmem:[%s4708_s6 + $0x16c] ss:$16 sps:$4 sm:$0xff]  }
 0x19a   : > { %1519 = vmatprep.subr.bf16.mxu1 %v3475_v4  ;;  %v3505_v4 = vld [vmem:[%s4708_s6 + $0x1ac] ss:$16 sps:$4 sm:$0xff]  }
 0x19c   : > { %3195 = vmatpush3.bf16.msra.mxu0 %v4059_v20 }
 0x19d   : > { %1520 = vmatpush1.bf16.msra.mxu1 %v3473_v9  ;;  %3197 = vmatprep.subr.bf16.mxu0 %v4065_v22  ;;  %v3506_v9 = vld [vmem:[%s4708_s6 + $0x1c8] ss:$16 sps:$4 sm:$0xff]  }
 0x19e   : > { %1521 = vmatprep.subr.bf16.mxu1 %v3478_v16  ;;  %v3514_v16 = vld [vmem:[%s4708_s6 + $0x20c] ss:$16 sps:$4 sm:$0xff]  }
 0x1a0   : > { %3199 = vmatpush3.bf16.msra.mxu0 %v4083_v28 }
 0x1a1   : > { %1522 = vmatpush1.bf16.msra.mxu1 %v3476_v21  ;;  %3201 = vmatprep.subr.bf16.mxu0 %v4089_v31  ;;  %v3515_v21 = vld [vmem:[%s4708_s6 + $0x228] ss:$16 sps:$4 sm:$0xff]  }
 0x1a2   : > { %1523 = vmatprep.subr.bf16.mxu1 %v3481_v25  ;;  %v3526_v25 = vld [vmem:[%s4708_s6 + $0x28c] ss:$16 sps:$4 sm:$0xff]  }
 0x1a4   : > { %3203 = vmatpush3.bf16.msra.mxu0 %v4107_v38 }
 0x1a5   : > { %1524 = vmatpush1.bf16.msra.mxu1 %v3479_v30  ;;  %3205 = vmatprep.subr.bf16.mxu0 %v4113_v13  ;;  %v3527_v30 = vld [vmem:[%s4708_s6 + $0x2a8] ss:$16 sps:$4 sm:$0xff]  }
 0x1a6   : > { %1525 = vmatprep.subr.bf16.mxu1 %v3484_v35  ;;  %v3535_v35 = vld [vmem:[%s4708_s6 + $0x2ec] ss:$16 sps:$4 sm:$0xff]  }
 0x1a8   : > { %3207 = vmatpush3.bf16.msra.mxu0 %v4131_v45 }
 0x1a9   : > { %1526 = vmatpush1.bf16.msra.mxu1 %v3482_v39  ;;  %3209 = vmatprep.subr.bf16.mxu0 %v4137_v48  ;;  %v3536_v39 = vld [vmem:[%s4708_s6 + $0x308] ss:$16 sps:$4 sm:$0xff]  }
 0x1aa   : > { %1527 = vmatprep.subr.bf16.mxu1 %v3487_v42  ;;  %v3544_v42 = vld [vmem:[%s4708_s6 + $0x34c] ss:$16 sps:$4 sm:$0xff]  }
 0x1ac   : > { %3211 = vmatpush3.bf16.msra.mxu0 %v4149_v54 }
 0x1ad   : > { %1528 = vmatpush1.bf16.msra.mxu1 %v3485_v46  ;;  %3245 = vmatprep.subr.bf16.mxu0 %v3982_v52  ;;  %v3497_v52 = vld [vmem:[%s4708_s6 + $0x168] ss:$16 sps:$4 sm:$0xff]  }
 0x1ae   : > { %1529 = vmatprep.subr.bf16.mxu1 %v3490_v53  ;;  %v3545_v46 = vld [vmem:[%s4708_s6 + $0x368] ss:$16 sps:$4 sm:$0xff]   ;;  %v3553_v53 = vld [vmem:[%s4708_s6 + $0x3ac] ss:$16 sps:$4 sm:$0xff]  }
 0x1b1   : > { %1530 = vmatpush1.bf16.msra.mxu1 %v3488_v56  ;;  %v3551_v56 = vld [vmem:[%s4708_s6 + $0x3a8] ss:$16 sps:$4 sm:$0xff]  }
 0x1b2   : > { %1531 = vmatprep.subr.bf16.mxu1 %v3493_v18  ;;  %v3556_v18 = vld [vmem:[%s4708_s6 + $0x3cc] ss:$16 sps:$4 sm:$0xff]  }
 0x1b5   : > { %1532 = vmatpush1.bf16.msra.mxu1 %v3491_v60  ;;  %v4291_v60 = vld [vmem:[%s4709_s7] sm:$0xf] }
 0x1b6   : > { %1533 = vmatprep.subr.bf16.mxu1 %v3496_v61  ;;  %v3554_v61 = vld [vmem:[%s4708_s6 + $0x3c8] ss:$16 sps:$4 sm:$0xff]  }
 0x1b9   : > { %1534 = vmatpush1.bf16.msra.mxu1 %v3494_v62  ;;  %v1414_v62 = vrot.slane %v4291_v60, %v3820_v47 }
 0x1ba   : > { %1535 = vmatprep.subr.bf16.mxu1 %v3499_v0  ;;  %v3559_v0 = vld [vmem:[%s4708_s6 + $0x3ec] ss:$16 sps:$4 sm:$0xff]  }
 0x1bd   : > { %1536 = vmatpush1.bf16.msra.mxu1 %v3497_v52  ;;  %v1418_v52 = vrot.slane %v4291_v60, %v751_v12 }
 0x1be   : > { %1537 = vmatprep.subr.bf16.mxu1 %v3502_v2  ;;  %v1655_v2 = vld [vmem:[%s4712_s10 + $0x180] sm:$0xff] }
 0x1c1   : > { %1538 = vmatpush1.bf16.msra.mxu1 %v3500_v3  ;;  %v1656_v3 = vld [vmem:[%s4712_s10 + $0x188] sm:$0xff] }
 0x1c2   : > { %1539 = vmatprep.subr.bf16.mxu1 %v3505_v4  ;;  %v4313_v12 = vpack.c.bf16 %v1656_v3, %v1655_v2  ;;  %v1669_v3 = vld [vmem:[%s4712_s10 + $0x1f0] sm:$0xff] }
 0x1c5   : > { %1540 = vmatpush1.bf16.msra.mxu1 %v3503_v6  ;;  %v3557_v6 = vld [vmem:[%s4708_s6 + $0x3e8] ss:$16 sps:$4 sm:$0xff]  }
 0x1c6   : > { %1541 = vmatprep.subr.bf16.mxu1 %v3508_v7 }
 0x1c9   : > { %1542 = vmatpush1.bf16.msra.mxu1 %v3506_v9 }
 0x1ca   : > { %1543 = vmatprep.subr.bf16.mxu1 %v3511_v14 }
 0x1cd   : > { %1544 = vmatpush1.bf16.msra.mxu1 %v3509_v15 }
 0x1ce   : > { %1554 = vmatprep.subr.bf16.mxu1 %v3514_v16 }
 0x1d0   : > { %1546 = vmatmul.mubr.bf16.vlgmr.msra.gmra.mrb[4].mxu1 %v3840_v55  ;;  %v3523_v55 = vld [vmem:[%s4708_s6 + $0x26c] ss:$16 sps:$4 sm:$0xff]  }
 0x1d1   : > { %1555 = vmatpush1.bf16.msra.mxu1 %v3512_v17  ;;  %1586 = vmatprep.mubr.bf16.mxu1 %v3845_v57  ;;  %v3521_v57 = vld [vmem:[%s4708_s6 + $0x268] ss:$16 sps:$4 sm:$0xff]  }
 0x1d2   : > { %1556 = vmatprep.subr.bf16.mxu1 %v3517_v19  ;;  %v1639_v19 = vld [vmem:[%s4712_s10 + $0x100] sm:$0xff] }
 0x1d5   : > { %1557 = vmatpush1.bf16.msra.mxu1 %v3515_v21  ;;  %v1640_v21 = vld [vmem:[%s4712_s10 + $0x108] sm:$0xff] }
 0x1d6   : > { %1558 = vmatprep.subr.bf16.mxu1 %v3520_v23 }
 0x1d9   : > { %1559 = vmatpush1.bf16.msra.mxu1 %v3518_v24  ;;  %v1657_v24 = vld [vmem:[%s4712_s10 + $0x190] sm:$0xff] }
 0x1da   : > { %1560 = vmatprep.subr.bf16.mxu1 %v3523_v55  ;;  %v1658_v55 = vld [vmem:[%s4712_s10 + $0x198] sm:$0xff] }
 0x1dd   : > { %1561 = vmatpush1.bf16.msra.mxu1 %v3521_v57 }
 0x1de   : > { %1562 = vmatprep.subr.bf16.mxu1 %v3526_v25 }
 0x1e1   : > { %1563 = vmatpush1.bf16.msra.mxu1 %v3524_v26  ;;  %v4332_v26 = vpack.c.bf16 %v1640_v21, %v1639_v19 }
 0x1e2   : > { %1564 = vmatprep.subr.bf16.mxu1 %v3529_v27 }
 0x1e5   : > { %1565 = vmatpush1.bf16.msra.mxu1 %v3527_v30  ;;  %v4337_v30 = vpack.c.bf16 %v1658_v55, %v1657_v24  ;;  %v1422_v55 = vrot.slane %v4291_v60, %v755_v29 }
 0x1e6   : > { %1566 = vmatprep.subr.bf16.mxu1 %v3532_v32  ;;  %v1641_v32 = vld [vmem:[%s4712_s10 + $0x110] sm:$0xff] }
 0x1e9   : > { %1567 = vmatpush1.bf16.msra.mxu1 %v3530_v33  ;;  %v1642_v33 = vld [vmem:[%s4712_s10 + $0x118] sm:$0xff] }
 0x1ea   : > { %1568 = vmatprep.subr.bf16.mxu1 %v3535_v35  ;;  %v1659_v35 = vld [vmem:[%s4712_s10 + $0x1a0] sm:$0xff] }
 0x1ed   : > { %1569 = vmatpush1.bf16.msra.mxu1 %v3533_v36  ;;  %v1660_v36 = vld [vmem:[%s4712_s10 + $0x1a8] sm:$0xff] }
 0x1ee   : > { %1570 = vmatprep.subr.bf16.mxu1 %v3538_v37  ;;  %v4356_v37 = vpack.c.bf16 %v1642_v33, %v1641_v32 }
 0x1f1   : > { %1571 = vmatpush1.bf16.msra.mxu1 %v3536_v39  ;;  %v1643_v39 = vld [vmem:[%s4712_s10 + $0x120] sm:$0xff] }
 0x1f2   : > { %1572 = vmatprep.subr.bf16.mxu1 %v3541_v40  ;;  %v1644_v40 = vld [vmem:[%s4712_s10 + $0x128] sm:$0xff] }
 0x1f5   : > { %1573 = vmatpush1.bf16.msra.mxu1 %v3539_v41  ;;  %v4376_v41 = vpack.c.bf16 %v1644_v40, %v1643_v39 }
 0x1f6   : > { %1574 = vmatprep.subr.bf16.mxu1 %v3544_v42 }
 0x1f9   : > { %1575 = vmatpush1.bf16.msra.mxu1 %v3542_v43  ;;  %v1645_v43 = vld [vmem:[%s4712_s10 + $0x130] sm:$0xff] }
 0x1fa   : > { %1576 = vmatprep.subr.bf16.mxu1 %v3547_v44  ;;  %v1646_v44 = vld [vmem:[%s4712_s10 + $0x138] sm:$0xff] }
 0x1fd   : > { %1577 = vmatpush1.bf16.msra.mxu1 %v3545_v46  ;;  %v4396_v46 = vpack.c.bf16 %v1646_v44, %v1645_v43 }
 0x1fe   : > { %1578 = vmatprep.subr.bf16.mxu1 %v3550_v50 }
 0x201   : > { %1579 = vmatpush1.bf16.msra.mxu1 %v3548_v51  ;;  %v1647_v51 = vld [vmem:[%s4712_s10 + $0x140] sm:$0xff] }
 0x202   : > { %1580 = vmatprep.subr.bf16.mxu1 %v3553_v53  ;;  %v1648_v53 = vld [vmem:[%s4712_s10 + $0x148] sm:$0xff] }
 0x205   : > { %1581 = vmatpush1.bf16.msra.mxu1 %v3551_v56  ;;  %v4416_v56 = vpack.c.bf16 %v1648_v53, %v1647_v51  ;;  %v2050_v53 = vld [vmem:[%s4713_s11 + $0x38] sm:$0xff] }
 0x206   : > { %1582 = vmatprep.subr.bf16.mxu1 %v3556_v18 }
 0x208   : > { %v1506_v4 = vpop.f32.mrb[4].mxu0 }
 0x209   : > { %1583 = vmatpush1.bf16.msra.mxu1 %v3554_v61  ;;  %v3340_v7 = vadd.f32 %v1506_v4, %v1414_v62  ;;  %v1508_v9 = vpop.f32.mrb[5].mxu0  ;;  %v1649_v61 = vld [vmem:[%s4712_s10 + $0x150] sm:$0xff]  ;;  %v1650_v62 = vld [vmem:[%s4712_s10 + $0x158] sm:$0xff] }
 0x20a   : > { %1584 = vmatprep.subr.bf16.mxu1 %v3559_v0  ;;  %v3341_v14 = vadd.f32 %v1508_v9, %v1418_v52  ;;  %v1510_v15 = vpop.f32.mrb[6].mxu0  ;;  %v4436_v0 = vpack.c.bf16 %v1650_v62, %v1649_v61  ;;  %v1670_v4 = vld [vmem:[%s4712_s10 + $0x1f8] sm:$0xff]  ;;  %v2045_v61 = vld [vmem:[%s4713_s11 + $0x10] sm:$0xff] }
 0x20b   : > { %vm1595_vm3 = vcmp.ge.f32.partialorder %v3340_v7, 0.0  ;;  %v1599_v16 = vmul.f32 0.2, %v3340_v7  ;;  %v1511_v17 = vpop.f32.mrb[7].mxu0  ;;  %v3240_v9 = vpack.c.bf16 %v1670_v4, %v1669_v3  ;;  %v1654_v15 = vld [vmem:[%s4712_s10 + $0x178] sm:$0xff]  ;;  %v2049_v62 = vld [vmem:[%s4713_s11 + $0x30] sm:$0xff] }
 0x20c   : > { %v1600_v23 = vmul.f32 0.2, %v3341_v14  ;;  %vm1596_vm4 = vcmp.ge.f32.partialorder %v3341_v14, 0.0 }
 0x20d   : > { %1585 = vmatpush1.bf16.msra.mxu1 %v3557_v6  ;;  %v4327_v57 = vsel %vm1595_vm3, %v3340_v7, %v1599_v16 }
 0x20e   : > { %v4329_v25 = vsel %vm1596_vm4, %v3341_v14, %v1600_v23  ;;  %3213 = vmatprep.subr.bf16.mxu1 %v4313_v12  ;;  %v1653_v14 = vld [vmem:[%s4712_s10 + $0x170] sm:$0xff] }
 0x20f   : > { %1735 = vmatprep.mubr.f32.mxu0 %v4329_v25  ;;  %v1812_v27 = vmul.f32 %v4329_v25, %v4329_v25  ;;  %v3242_v17 = vpack.c.bf16 %v1654_v15, %v1653_v14 }
 0x210   : > { %1587 = vmatmul.mubr.bf16.vlgmr.msra.gmra.mrb[4].mxu1 %v3953_v34  ;;  %1736 = vmatmul.mubr.f32.vlgmr.msra.gmra.mrb[8].mxu0 %v4327_v57  ;;  %v4359_v34 = vpack.c.bf16 %v1660_v36, %v1659_v35 }
 0x211   : > { %3247 = vmatpush3.bf16.msra.mxu0 %v3993_v58  ;;  %1879 = vmatprep.mubr.f32.mxu0 %v1812_v27  ;;  %v1661_v58 = vld [vmem:[%s4712_s10 + $0x1b0] sm:$0xff]  ;;  %v1426_v27 = vrot.slane %v4291_v60, %v759_v49 }
 0x212   : > { %3249 = vmatprep.subr.bf16.mxu0 %v3995_v59  ;;  %3215 = vmatpush3.bf16.msra.mxu1 %v4332_v26  ;;  %v1662_v59 = vld [vmem:[%s4712_s10 + $0x1b8] sm:$0xff] }
 0x213   : > { %3217 = vmatprep.subr.bf16.mxu1 %v4337_v30  ;;  %v4379_v42 = vpack.c.bf16 %v1662_v59, %v1661_v58 }
 0x215   : > { %3251 = vmatpush3.bf16.msra.mxu0 %v4011_v63  ;;  %v1663_v63 = vld [vmem:[%s4712_s10 + $0x1c0] sm:$0xff] }
 0x216   : > { %3253 = vmatprep.subr.bf16.mxu0 %v4017_v1  ;;  %3219 = vmatpush3.bf16.msra.mxu1 %v4356_v37  ;;  %v1664_v1 = vld [vmem:[%s4712_s10 + $0x1c8] sm:$0xff] }
 0x217   : > { %3221 = vmatprep.subr.bf16.mxu1 %v4359_v34  ;;  %v4399_v50 = vpack.c.bf16 %v1664_v1, %v1663_v63  ;;  %v2044_v1 = vld [vmem:[%s4713_s11 + $0x8] sm:$0xff] }
 0x219   : > { %3255 = vmatpush3.bf16.msra.mxu0 %v4035_v8  ;;  %v1665_v8 = vld [vmem:[%s4712_s10 + $0x1d0] sm:$0xff] }
 0x21a   : > { %3257 = vmatprep.subr.bf16.mxu0 %v4041_v10  ;;  %3223 = vmatpush3.bf16.msra.mxu1 %v4376_v41  ;;  %v1666_v10 = vld [vmem:[%s4712_s10 + $0x1d8] sm:$0xff] }
 0x21b   : > { %3225 = vmatprep.subr.bf16.mxu1 %v4379_v42  ;;  %v4419_v18 = vpack.c.bf16 %v1666_v10, %v1665_v8  ;;  %v2043_v8 = vld [vmem:[%s4713_s11] sm:$0xff] }
 0x21c   : > { %v2047_v10 = vld [vmem:[%s4713_s11 + $0x20] sm:$0xff] }
 0x21d   : > { %3259 = vmatpush3.bf16.msra.mxu0 %v4059_v20  ;;  %v1667_v20 = vld [vmem:[%s4712_s10 + $0x1e0] sm:$0xff] }
 0x21e   : > { %3261 = vmatprep.subr.bf16.mxu0 %v4065_v22  ;;  %3227 = vmatpush3.bf16.msra.mxu1 %v4396_v46  ;;  %v1668_v22 = vld [vmem:[%s4712_s10 + $0x1e8] sm:$0xff] }
 0x21f   : > { %3229 = vmatprep.subr.bf16.mxu1 %v4399_v50  ;;  %v4439_v52 = vpack.c.bf16 %v1668_v22, %v1667_v20  ;;  %v2052_v20 = vld [vmem:[%s4713_s11 + $0x48] sm:$0xff]  ;;  %v3318_v22 = vpack.c.bf16 %v2049_v62, %v2045_v61  ;;  %v3576_v61 = vld [vmem:[%s4714_s12 + $0x18] sm:$0xff]  }
 0x220   : > { %v3577_v62 = vld [vmem:[%s4714_s12 + $0x98] sm:$0xff]  }
 0x221   : > { %3263 = vmatpush3.bf16.msra.mxu0 %v4083_v28  ;;  %v1811_v28 = vmul.f32 %v4327_v57, %v4327_v57 }
 0x222   : > { %3265 = vmatprep.subr.bf16.mxu0 %v4089_v31  ;;  %3231 = vmatpush3.bf16.msra.mxu1 %v4416_v56  ;;  %v3560_v31 = vld [vmem:[%s4710_s8] sm:$0xff]  }
 0x223   : > { %3233 = vmatprep.subr.bf16.mxu1 %v4419_v18 }
 0x225   : > { %3267 = vmatpush3.bf16.msra.mxu0 %v4107_v38  ;;  %v3561_v38 = vld [vmem:[%s4710_s8 + $0x8] sm:$0xff]  }
 0x226   : > { %3269 = vmatprep.subr.bf16.mxu0 %v4113_v13  ;;  %3235 = vmatpush3.bf16.msra.mxu1 %v4436_v0  ;;  %v1651_v13 = vld [vmem:[%s4712_s10 + $0x160] sm:$0xff] }
 0x227   : > { %3237 = vmatprep.subr.bf16.mxu1 %v4439_v52 }
 0x229   : > { %3271 = vmatpush3.bf16.msra.mxu0 %v4131_v45  ;;  %v1652_v45 = vld [vmem:[%s4712_s10 + $0x168] sm:$0xff] }
 0x22a   : > { %3273 = vmatprep.subr.bf16.mxu0 %v4137_v48  ;;  %v2788_v48 = vld [vmem:[%s4706_s4] ss:$0 sm:$0xff] }
 0x22d   : > { %3275 = vmatpush3.bf16.msra.mxu0 %v4149_v54  ;;  %v3238_v54 = vpack.c.bf16 %v1652_v45, %v1651_v13  ;;  %v2051_v13 = vld [vmem:[%s4713_s11 + $0x40] sm:$0xff] }
 0x22e   : > { %3172 = vmatprep.subr.bf16.mxu0 %v3608_v5  ;;  %v2055_v45 = vld [vmem:[%s4713_s11 + $0x60] sm:$0xff] }
 0x22f   : > { %3239 = vmatpush3.bf16.msra.mxu1 %v3238_v54 }
 0x230   : > { %1880 = vmatmul.mubr.f32.vlgmr.msra.gmra.mrb[10].mxu0 %v1811_v28  ;;  %3241 = vmatprep.subr.bf16.mxu1 %v3240_v9  ;;  %v2058_v28 = vld [vmem:[%s4713_s11 + $0x78] sm:$0xff] }
 0x231   : > { %3173 = vmatpush3.bf16.msra.mxu0 %v3560_v31  ;;  %3176 = vmatprep.mubr.msk.bf16.mxu0 %vm3609_vm1, %v3608_v5 }
 0x232   : > { %3174 = vmatprep.subr.bf16.mxu0 %v3608_v5 }
 0x233   : > { %3243 = vmatpush3.bf16.msra.mxu1 %v3242_v17 }
 0x234   : > { %3277 = vmatprep.subr.bf16.mxu1 %v4313_v12 }
 0x235   : > { %3175 = vmatpush3.bf16.msra.mxu0 %v3561_v38 }
 0x263   : > { %v606_v2 = vpop.f32.mrb[0].mxu1 }
 0x264   : > { %v607_v6 = vadd.f32 %v2788_v48, %v606_v2  ;;  %v3170_v7 = vpop.f32.mrb[1].mxu1  ;;  %v2053_v48 = vld [vmem:[%s4713_s11 + $0x50] sm:$0xff] }
 0x265   : > { %v609_v16 = vpop.f32.mrb[2].mxu1  ;;  %v2057_v2 = vld [vmem:[%s4713_s11 + $0x70] sm:$0xff] }
 0x266   : > { %vm612_vm5 = vcmp.ge.f32.partialorder %v607_v6, 0.0  ;;  %v613_v19 = vmul.f32 0.2, %v607_v6  ;;  %v3171_v21 = vpop.f32.mrb[3].mxu1  ;;  %v3322_v3 = vpack.c.bf16 %v2057_v2, %v2053_v48  ;;  %v3587_v48 = vld [vmem:[%s4714_s12 + $0xf0] sm:$0xff]  }
 0x267   : > { %v3589_v2 = vld [vmem:[%s4714_s12 + $0xb0] sm:$0xff]  }
 0x268   : > { %v614_v23 = vsel %vm612_vm5, %v607_v6, %v613_v19 }
 0x269   : > { %v1964_v24 = vpack.c.bf16 %v614_v23, %v614_v23 }
 0x26b   : > { %3177 = vmatmul.mubr.msk.bf16.vlgmr.msra.gmra.mrb[12].mxu0 %vm466_vm0, %v1964_v24 }
 0x26c   : > { %2197 = vmatprep.mubr.f32.mxu0 %v3608_v5 }
 0x2e3   : > { %v1588_v32 = vpop.f32.mrb[4].mxu1  ;;  %v3001_v33 = vpop.f32.mrb[8].mxu0 }
 0x2e4   : > { %v3342_v35 = vadd.f32 %v1588_v32, %v1422_v55  ;;  %v1590_v36 = vpop.f32.mrb[5].mxu1  ;;  %v3002_v39 = vpop.f32.mrb[9].mxu0  ;;  %v2920_v55 = vld [vmem:[%s4711_s9] ss:$0 sm:$0xff] }
 0x2e5   : > { %v3343_v40 = vadd.f32 %v1590_v36, %v1426_v27  ;;  %v1592_v12 = vpop.f32.mrb[6].mxu1  ;;  %v4490_v58 = vadd.f32 %v3002_v39, %v3001_v33 }
 0x2e6   : > { %v1601_v59 = vmul.f32 0.2, %v3342_v35  ;;  %v1593_v43 = vpop.f32.mrb[7].mxu1  ;;  %vm1597_vm6 = vcmp.ge.f32.partialorder %v3342_v35, 0.0  ;;  %v3562_v12 = vld [vmem:[%s4714_s12 + $0x40] sm:$0xff]  }
 0x2e7   : > { %v1602_v44 = vmul.f32 0.2, %v3343_v40  ;;  %vm1598_vm7 = vcmp.ge.f32.partialorder %v3343_v40, 0.0 }
 0x2e8   : > { %v4495_v11 = vsel %vm1597_vm6, %v3342_v35, %v1601_v59 }
 0x2e9   : > { %v4492_v63 = vsel %vm1598_vm7, %v3343_v40, %v1602_v44  ;;  %v2207_v44 = vrot.slane %v4327_v57, %v3820_v47 }
 0x2ea   : > { %1805 = vmatprep.mubr.f32.mxu1 %v4492_v63  ;;  %v1814_v49 = vmul.f32 %v4492_v63, %v4492_v63 }
 0x2eb   : > { %1806 = vmatmul.mubr.f32.vlgmr.msra.gmra.mrb[8].mxu1 %v4495_v11 }
 0x2ec   : > { %3279 = vmatpush3.bf16.msra.mxu1 %v4332_v26  ;;  %1949 = vmatprep.mubr.f32.mxu1 %v1814_v49 }
 0x2ed   : > { %3281 = vmatprep.subr.bf16.mxu1 %v4337_v30  ;;  %v1813_v30 = vmul.f32 %v4495_v11, %v4495_v11 }
 0x2f0   : > { %3283 = vmatpush3.bf16.msra.mxu1 %v4356_v37 }
 0x2f1   : > { %3285 = vmatprep.subr.bf16.mxu1 %v4359_v34 }
 0x2f4   : > { %3287 = vmatpush3.bf16.msra.mxu1 %v4376_v41 }
 0x2f5   : > { %3289 = vmatprep.subr.bf16.mxu1 %v4379_v42 }
 0x2f8   : > { %3291 = vmatpush3.bf16.msra.mxu1 %v4396_v46  ;;  %v2048_v46 = vld [vmem:[%s4713_s11 + $0x28] sm:$0xff] }
 0x2f9   : > { %3293 = vmatprep.subr.bf16.mxu1 %v4399_v50  ;;  %v2046_v50 = vld [vmem:[%s4713_s11 + $0x18] sm:$0xff]  ;;  %v3308_v51 = vpack.c.bf16 %v2048_v46, %v2044_v1  ;;  %v3568_v46 = vld [vmem:[%s4714_s12 + $0x8] sm:$0xff]  }
 0x2fc   : > { %3295 = vmatpush3.bf16.msra.mxu1 %v4416_v56  ;;  %v3316_v56 = vpack.c.bf16 %v2050_v53, %v2046_v50  ;;  %v3569_v50 = vld [vmem:[%s4714_s12 + $0x88] sm:$0xff]   ;;  %v3571_v53 = vld [vmem:[%s4714_s12 + $0xd0] sm:$0xff]  }
 0x2fd   : > { %3297 = vmatprep.subr.bf16.mxu1 %v4419_v18  ;;  %v3310_v18 = vpack.c.bf16 %v2047_v10, %v2043_v8  ;;  %v3572_v8 = vld [vmem:[%s4714_s12 + $0x10] sm:$0xff]  }
 0x2fe   : > { %3317 = vmatprep.subr.bf16.mxu0 %v3316_v56  ;;  %v3573_v10 = vld [vmem:[%s4714_s12 + $0x90] sm:$0xff]  }
 0x2ff   : > { %3319 = vmatpush1.bf16.msra.mxu0 %v3318_v22 }
 0x300   : > { %3299 = vmatpush3.bf16.msra.mxu1 %v4436_v0  ;;  %v2056_v0 = vld [vmem:[%s4713_s11 + $0x68] sm:$0xff] }
 0x301   : > { %3301 = vmatprep.subr.bf16.mxu1 %v4439_v52  ;;  %v2054_v52 = vld [vmem:[%s4713_s11 + $0x58] sm:$0xff]  ;;  %v3312_v31 = vpack.c.bf16 %v2056_v0, %v2052_v20  ;;  %v3578_v20 = vld [vmem:[%s4714_s12 + $0x60] sm:$0xff]  }
 0x302   : > { %v3320_v38 = vpack.c.bf16 %v2058_v28, %v2054_v52  ;;  %v3580_v0 = vld [vmem:[%s4714_s12 + $0x20] sm:$0xff]   ;;  %v3582_v28 = vld [vmem:[%s4714_s12 + $0x68] sm:$0xff]  }
 0x303   : > { %v3071_v29 = vpop.f32.mrb[10].mxu0  ;;  %v3581_v52 = vld [vmem:[%s4714_s12 + $0xa0] sm:$0xff]  }
 0x304   : > { %3303 = vmatpush3.bf16.msra.mxu1 %v3238_v54  ;;  %v3072_v60 = vpop.f32.mrb[11].mxu0  ;;  %v3314_v54 = vpack.c.bf16 %v2055_v45, %v2051_v13  ;;  %3321 = vmatprep.subr.bf16.mxu0 %v3320_v38  ;;  %v3585_v13 = vld [vmem:[%s4714_s12 + $0xa8] sm:$0xff]   ;;  %v3586_v45 = vld [vmem:[%s4714_s12 + $0x70] sm:$0xff]  }
 0x305   : > { %3305 = vmatprep.subr.bf16.mxu1 %v3240_v9  ;;  %v3073_v26 = vadd.f32 %v3072_v60, %v3071_v29  ;;  %3323 = vmatpush1.bf16.msra.mxu0 %v3322_v3  ;;  %v2211_v60 = vrot.slane %v4329_v25, %v3820_v47  ;;  %v3565_v25 = vld [vmem:[%s4714_s12 + $0x80] sm:$0xff]  }
 0x306   : > { %3333 = vmatprep.subr.bf16.mxu0 %v3316_v56  ;;  %v3574_v56 = vld [vmem:[%s4714_s12 + $0x58] sm:$0xff]  }
 0x308   : > { %3307 = vmatpush3.bf16.msra.mxu1 %v3242_v17 }
 0x309   : > { %3309 = vmatprep.subr.bf16.mxu1 %v3308_v51 }
 0x30b   : > { %1950 = vmatmul.mubr.f32.vlgmr.msra.gmra.mrb[10].mxu1 %v1813_v30 }
 0x30c   : > { %2126 = vmatprep.mubr.f32.mxu1 %v3608_v5  ;;  %3311 = vmatpush1.bf16.msra.mxu1 %v3310_v18 }
 0x30d   : > { %3313 = vmatprep.subr.bf16.mxu1 %v3312_v31 }
 0x310   : > { %3315 = vmatpush1.bf16.msra.mxu1 %v3314_v54 }
 0x311   : > { %3325 = vmatprep.subr.bf16.mxu1 %v3308_v51  ;;  %v3570_v51 = vld [vmem:[%s4714_s12 + $0x50] sm:$0xff]  }
 0x33e   : > { %v2021_v37 = vpop.f32.mrb[12].mxu0 }
 0x33f   : > { %v3178_v34 = vpop.f32.mrb[13].mxu0  ;;  %v2022_v27 = vadd.f32 %v2920_v55, %v2021_v37 }
 0x340   : > { %v2024_v41 = vpop.f32.mrb[14].mxu0 }
 0x341   : > { %v3179_v42 = vpop.f32.mrb[15].mxu0  ;;  %v2027_v33 = vadd.f32 1.0, %v2022_v27 }
 0x3be   : > { %v3036_v4 = vpop.f32.mrb[8].mxu1 }
 0x3bf   : > { %v3037_v6 = vpop.f32.mrb[9].mxu1 }
 0x3c0   : > { %v3038_v7 = vadd.f32 %v3037_v6, %v3036_v4  ;;  %v3591_v4 = vld [vmem:[%s4714_s12 + $0xf8] sm:$0xff]  }
 0x3c1   : > { %v3592_v6 = vld [vmem:[%s4714_s12 + $0x38] sm:$0xff]  }
 0x3c2   : > { %v1808_v9 = vadd.f32 %v3038_v7, %v4490_v58  ;;  %v3563_v58 = vld [vmem:[%s4714_s12 + $0xc0] sm:$0xff]   ;;  %v3593_v7 = vld [vmem:[%s4714_s12 + $0xb8] sm:$0xff]  }
 0x3c4   : > { %v1955_v17 = vmul.f32 %v1808_v9, %v1808_v9  ;;  %v2036_v36 = vrot.slane %v1808_v9, %v3820_v47 }
 0x3de   : > { %v3106_v14 = vpop.f32.mrb[10].mxu1 }
 0x3df   : > { %v3107_v15 = vpop.f32.mrb[11].mxu1 }
 0x3e0   : > { %v3108_v16 = vadd.f32 %v3107_v15, %v3106_v14 }
 0x3e2   : > { %v1952_v19 = vadd.f32 %v3108_v16, %v3073_v26  ;;  %v2219_v26 = vrot.slane %v4492_v63, %v3820_v47  ;;  %v3567_v63 = vld [vmem:[%s4714_s12 + $0xc8] sm:$0xff]  }
 0x3e4   : > { %v1956_v21 = vsub.f32 %v1952_v19, %v1955_v17 }
 0x3e6   : > { %v1957_v23 = vmax.f32 %v1956_v21, 0.0 }
 0x3e8   : > { %v1958_v24 = vadd.f32 1e-05, %v1957_v23 }
 0x3ea   : > { %3596 = vrsqrt.f32 %v1958_v24 }
 0x3f4   : > { %v3597_v32 = vpop.eup %3596 }
 0x3f5   : > { %v2031_v35 = vrot.slane %v3597_v32, %v3820_v47 }
 0x3f7   : > { %v2032_v39 = vmul.f32 %v2031_v35, %v2027_v33 }
 0x3f9   : > { %2924 = vmatmul.mubr.msk.f32.vlgmr.msra.gmra.mrb[12].mxu1 %vm466_vm0, %v2032_v39  ;;  %2925 = vmatmul.mubr.msk.f32.vlgmr.msra.gmra.mrb[16].mxu0 %vm466_vm0, %v2032_v39  ;;  %v2037_v40 = vmul.f32 %v2036_v36, %v2032_v39  ;;  %v2928_v36 = vld [vmem:[%s4715_s13] ss:$0 sm:$0xff] }
 0x3fa   : > { %3327 = vmatpush1.bf16.msra.mxu1 %v3310_v18  ;;  %3335 = vmatpush1.bf16.msra.mxu0 %v3318_v22  ;;  %v3575_v18 = vld [vmem:[%s4714_s12 + $0xd8] sm:$0xff]   ;;  %v3579_v22 = vld [vmem:[%s4714_s12 + $0xe0] sm:$0xff]  }
 0x3fb   : > { %2039 = vrot.lane.b32.xlu0 %v2037_v40, %s3610_s28  ;;  %3329 = vmatprep.subr.bf16.mxu1 %v3312_v31  ;;  %v3583_v31 = vld [vmem:[%s4714_s12 + $0xe8] sm:$0xff]  }
 0x3fc   : > { %3337 = vmatprep.subr.bf16.mxu0 %v3320_v38  ;;  %2293 = vmatprep.mubr.f32.mxu1 %v3608_v5  ;;  %v3584_v38 = vld [vmem:[%s4714_s12 + $0x28] sm:$0xff]  }
 0x3fd   : > { %2364 = vmatprep.mubr.f32.mxu0 %v3608_v5  ;;  %v2215_v5 = vrot.slane %v4495_v11, %v3820_v47  ;;  %v3564_v11 = vld [vmem:[%s4714_s12] sm:$0xff]   ;;  %v3566_v47 = vld [vmem:[%s4714_s12 + $0x48] sm:$0xff]  }
 0x3fe   : > { %3331 = vmatpush1.bf16.msra.mxu1 %v3314_v54  ;;  %3339 = vmatpush1.bf16.msra.mxu0 %v3322_v3  ;;  %v3588_v54 = vld [vmem:[%s4714_s12 + $0x30] sm:$0xff]   ;;  %v3590_v3 = vld [vmem:[%s4714_s12 + $0x78] sm:$0xff]  }
 0x3ff   : > { %3112 = vmatprep.subr.bf16.mxu1 %v3562_v12  ;;  %3134 = vmatprep.subr.bf16.mxu0 %v3563_v58 }
 0x46d   : > { %v2040_v59 = vpop.permute.xlu0 %2039 }
 0x46e   : > { %v2042_v43 = vsub.f32 %v2022_v27, %v2040_v59 }
 0x470   : > { %2225 = vrot.lane.b32.xlu1 %v2042_v43, %s3611_s20  ;;  %s462_s20 = scalar_lea.vmem %s4716_s14, %s2782_s15 }
 0x4cc   : > { %v2128_v49 = vpop.f32.mrb[12].mxu1  ;;  %v2199_v29 = vpop.f32.mrb[16].mxu0 }
 0x4cd   : > { %v4587_v30 = vmul.f32 %v2207_v44, %v2128_v49  ;;  %v4589_v37 = vmul.f32 %v2215_v5, %v2199_v29  ;;  %v2130_v34 = vpop.f32.mrb[13].mxu1  ;;  %v2201_v41 = vpop.f32.mrb[17].mxu0 }
 0x4ce   : > { %v4591_v42 = vmul.f32 %v2211_v60, %v2130_v34  ;;  %v4593_v57 = vmul.f32 %v2219_v26, %v2201_v41 }
 0x4e2   : > { %v2226_v1 = vpop.permute.xlu1 %2225 }
 0x4e3   : > { %2926 = vmatmul.mubr.msk.f32.vlgmr.msra.gmra.mrb[14].mxu1 %vm466_vm0, %v2226_v1  ;;  %2927 = vmatmul.mubr.msk.f32.vlgmr.msra.gmra.mrb[18].mxu0 %vm466_vm0, %v2226_v1 }
 0x4e4   : > { %3113 = vmatpush3.bf16.msra.mxu1 %v3564_v11  ;;  %3135 = vmatpush3.bf16.msra.mxu0 %v3565_v25 }
 0x4e5   : > { %3114 = vmatprep.subr.bf16.mxu1 %v3566_v47  ;;  %3136 = vmatprep.subr.bf16.mxu0 %v3567_v63 }
 0x4e8   : > { %3115 = vmatpush3.bf16.msra.mxu1 %v3568_v46  ;;  %3137 = vmatpush3.bf16.msra.mxu0 %v3569_v50 }
 0x4e9   : > { %3116 = vmatprep.subr.bf16.mxu1 %v3570_v51  ;;  %3138 = vmatprep.subr.bf16.mxu0 %v3571_v53 }
 0x4ec   : > { %3117 = vmatpush3.bf16.msra.mxu1 %v3572_v8  ;;  %3139 = vmatpush3.bf16.msra.mxu0 %v3573_v10 }
 0x4ed   : > { %3118 = vmatprep.subr.bf16.mxu1 %v3574_v56  ;;  %3140 = vmatprep.subr.bf16.mxu0 %v3575_v18 }
 0x4f0   : > { %3119 = vmatpush3.bf16.msra.mxu1 %v3576_v61  ;;  %3141 = vmatpush3.bf16.msra.mxu0 %v3577_v62 }
 0x4f1   : > { %3120 = vmatprep.subr.bf16.mxu1 %v3578_v20  ;;  %3142 = vmatprep.subr.bf16.mxu0 %v3579_v22 }
 0x4f4   : > { %3121 = vmatpush3.bf16.msra.mxu1 %v3580_v0  ;;  %3143 = vmatpush3.bf16.msra.mxu0 %v3581_v52 }
 0x4f5   : > { %3122 = vmatprep.subr.bf16.mxu1 %v3582_v28  ;;  %3144 = vmatprep.subr.bf16.mxu0 %v3583_v31 }
 0x4f8   : > { %3123 = vmatpush3.bf16.msra.mxu1 %v3584_v38  ;;  %3145 = vmatpush3.bf16.msra.mxu0 %v3585_v13 }
 0x4f9   : > { %3124 = vmatprep.subr.bf16.mxu1 %v3586_v45  ;;  %3146 = vmatprep.subr.bf16.mxu0 %v3587_v48 }
 0x4fc   : > { %3125 = vmatpush3.bf16.msra.mxu1 %v3588_v54  ;;  %3147 = vmatpush3.bf16.msra.mxu0 %v3589_v2 }
 0x4fd   : > { %3126 = vmatprep.subr.bf16.mxu1 %v3590_v3  ;;  %3148 = vmatprep.subr.bf16.mxu0 %v3591_v4 }
 0x500   : > { %3127 = vmatpush3.bf16.msra.mxu1 %v3592_v6  ;;  %3149 = vmatpush3.bf16.msra.mxu0 %v3593_v7 }
 0x5b6   : > { %v2295_v9 = vpop.f32.mrb[14].mxu1  ;;  %v2366_v14 = vpop.f32.mrb[18].mxu0 }
 0x5b7   : > { %v2371_v15 = vadd.f32 %v2295_v9, %v4587_v30  ;;  %v2373_v16 = vadd.f32 %v2366_v14, %v4589_v37  ;;  %v2297_v17 = vpop.f32.mrb[15].mxu1  ;;  %v2368_v19 = vpop.f32.mrb[19].mxu0 }
 0x5b8   : > { %v2372_v21 = vadd.f32 %v2297_v17, %v4591_v42  ;;  %v2374_v23 = vadd.f32 %v2368_v19, %v4593_v57 }
 0x5b9   : > { %v2439_v27 = vpack.c.bf16 %v2371_v15, %v2371_v15  ;;  %v2441_v32 = vpack.c.bf16 %v2373_v16, %v2373_v16 }
 0x5ba   : > { %v2440_v24 = vpack.c.bf16 %v2372_v21, %v2372_v21  ;;  %v2442_v55 = vpack.c.bf16 %v2374_v23, %v2374_v23 }
 0x5bc   : > { %2674 = vmatprep.mubr.bf16.mxu1 %v2440_v24  ;;  %2714 = vmatprep.mubr.bf16.mxu0 %v2442_v55 }
 0x5bd   : > { %2675 = vmatmul.mubr.bf16.vlgmr.msra.gmra.mrb[16].mxu1 %v2439_v27  ;;  %2715 = vmatmul.mubr.bf16.vlgmr.msra.gmra.mrb[20].mxu0 %v2441_v32 }
 0x690   : > { %v3128_v33 = vpop.f32.mrb[16].mxu1  ;;  %v3150_v35 = vpop.f32.mrb[20].mxu0 }
 0x691   : > { %v3129_v39 = vpop.f32.mrb[17].mxu1  ;;  %v3151_v40 = vpop.f32.mrb[21].mxu0 }
 0x692   : > { %v3130_v12 = vadd.f32 %v3129_v39, %v3128_v33  ;;  %v3152_v58 = vadd.f32 %v3151_v40, %v3150_v35  ;;  %v3131_v59 = vpop.f32.mrb[18].mxu1  ;;  %v3153_v43 = vpop.f32.mrb[22].mxu0 }
 0x693   : > { %v3132_v44 = vpop.f32.mrb[19].mxu1  ;;  %v3154_v5 = vpop.f32.mrb[23].mxu0 }
 0x694   : > { %v2677_v49 = vadd.f32 %v3130_v12, %v2928_v36 }
 0x696   : > { %v2717_v29 = vadd.f32 %v3152_v58, %v2677_v49 }
 0x698   : > { %3598 = vtanh.f32 %v2717_v29 }
 0x6a2   : > { %v3599_v60 = vpop.eup %3598 }
 0x6a3   : > { %2723 = vst [vmem:[%s462_s20] sm:$0xff] %v3599_v60 }
 0x6a4 PF: > { %s24_s29 = sadd.s32 1, %s3606_s29  }
 0x6a5   : > { %p21_p4 = scmp.ge.s32.totalorder %s24_s29, 4  }
 0x6a7   :  { %23 = sbr.rel (!%p21_p4) target bundleno = 1 (0x1), region = 106 }

</bundles_post_ra>
